<compile_context>
chip_gen: v6e
topology: v6e:2x2x1
jax: 0.10.0
libtpu: 0.0.40
codegen_flags: <defaults>
</compile_context>

<pallas_src>
import jax
import jax.numpy as jnp
from jax import lax
from jax.experimental import pallas as pl
from jax.experimental.pallas import tpu as pltpu


def lstm_fc_kernel(x_ref, wih_ref, whh_ref, wfc_ref, bfc_ref, out_ref, xg_ref):
    # x_ref:   (T*BP, I+1)   time-major, batch padded to BP; last column is 1.0
    # wih_ref: (I+1, 4*HP)   [W_ih ; b_ih+b_hh], (i,f,o) columns pre-scaled by 0.5
    # whh_ref: (HP, 4*HP)    recurrent weights, (i,f,o) columns pre-scaled by 0.5
    # wfc_ref: (1, HP)       fc weight row (output_size == 1), H-padded
    # bfc_ref: (1, 1)        fc bias
    # out_ref: (BP, 1)
    # xg_ref:  (T*BP, 4*HP)  VMEM scratch for the hoisted input projection
    TB = x_ref.shape[0]
    HP = whh_ref.shape[0]
    G4 = 4 * HP
    BP = out_ref.shape[0]
    T = TB // BP

    # (3) Hoisted input projection + bias (ones column): one MXU matmul for all T.
    xg_ref[...] = jnp.dot(x_ref[...], wih_ref[...],
                          preferred_element_type=jnp.float32)

    # (1) Per-lane affine constants for the fused single-tanh nonlinearity,
    # hoisted out of the recurrence (built once; no per-iter broadcast_in_dim).
    lane = lax.broadcasted_iota(jnp.int32, (BP, G4), 1)
    is_g = (lane >= 2 * HP) & (lane < 3 * HP)
    post_scale = jnp.where(is_g, 1.0, 0.5).astype(jnp.float32)
    post_bias = jnp.where(is_g, 0.0, 0.5).astype(jnp.float32)

    h = jnp.zeros((BP, HP), jnp.float32)
    c = jnp.zeros((BP, HP), jnp.float32)

    # T is small and static -> fully unrolled recurrence (cross-step scheduler
    # visibility).  TODO(synk): switch to lax.fori_loop(..., unroll=4..8) with
    # xg_ref[pl.ds(pl.multiple_of(t*BP, 8), BP), :] once T grows past ~16-32.
    for t in range(T):
        # sublane-aligned static row slab of the hoisted projection
        xg_t = xg_ref[t * BP:(t + 1) * BP, :]
        pre = xg_t + jnp.dot(h, whh_ref[...],
                             preferred_element_type=jnp.float32)
        # one EUP tanh over all four gate slabs, then one per-lane affine:
        #   sigmoid gates (i,f,o): 0.5*tanh(0.5*z)+0.5   (0.5 folded in weights)
        #   candidate gate (g):    tanh(z)
        act = jnp.tanh(pre) * post_scale + post_bias
        i_g = act[:, 0 * HP:1 * HP]
        f_g = act[:, 1 * HP:2 * HP]
        g_g = act[:, 2 * HP:3 * HP]
        o_g = act[:, 3 * HP:4 * HP]
        c = f_g * c + i_g * g_g
        h = o_g * jnp.tanh(c)

    # (5) FC on the last hidden state: output_size == 1 -> VPU multiply + reduce.
    out_ref[...] = (jnp.sum(h * wfc_ref[...], axis=-1, keepdims=True)
                    + bfc_ref[...])


def model_forward(x, params):
    """x: (B, T, I) float32 (PyTorch batch_first). Returns (B, O) with O == 1."""
    w_ih, w_hh, b_ih, b_hh, w_fc, b_fc = (params["w_ih"], params["w_hh"],
                                          params["b_ih"], params["b_hh"],
                                          params["w_fc"], params["b_fc"])
    B, T, I = x.shape
    H = w_hh.shape[1]
    O = w_fc.shape[0]
    assert O == 1, "kernel implements the module's output_size=1 FC as a reduce"

    HP = max(128, ((H + 127) // 128) * 128)   # lane-align each gate slab
    BP = ((B + 7) // 8) * 8                   # sublane-align batch slabs

    # 0.5 pre-scale for sigmoid gates (i, f, o); 1.0 for candidate gate (g).
    gate_scale = jnp.array([0.5, 0.5, 1.0, 0.5], jnp.float32).reshape(1, 4, 1)

    # ---- glue: layout / padding / parameter prep stays in plain JAX ----------
    # time-major, batch-padded x with a trailing ones column (bias folding)
    x_tm = jnp.transpose(x, (1, 0, 2)).astype(jnp.float32)            # (T, B, I)
    x_pad = jnp.zeros((T, BP, I + 1), jnp.float32)
    x_pad = x_pad.at[:, :B, :I].set(x_tm)
    x_pad = x_pad.at[:, :, I].set(1.0)
    x_flat = x_pad.reshape(T * BP, I + 1)                             # (T*BP, I+1)

    # W_ih with the folded bias row appended, gate-padded, sigmoid cols * 0.5
    wih_g = w_ih.T.astype(jnp.float32).reshape(I, 4, H)
    b_g = (b_ih + b_hh).astype(jnp.float32).reshape(1, 4, H)
    wih_aug = jnp.concatenate([wih_g, b_g], axis=0)                    # (I+1, 4, H)
    wih_p = (jnp.zeros((I + 1, 4, HP), jnp.float32)
             .at[:, :, :H].set(wih_aug) * gate_scale).reshape(I + 1, 4 * HP)

    whh_g = w_hh.T.astype(jnp.float32).reshape(H, 4, H)
    whh_p = (jnp.zeros((HP, 4, HP), jnp.float32)
             .at[:H, :, :H].set(whh_g) * gate_scale).reshape(HP, 4 * HP)

    wfc_p = (jnp.zeros((1, HP), jnp.float32)
             .at[:, :H].set(w_fc.astype(jnp.float32)))                # (1, HP)
    bfc = b_fc.astype(jnp.float32).reshape(1, 1)                      # (1, 1)

    out_p = pl.pallas_call(
        lstm_fc_kernel,
        out_shape=jax.ShapeDtypeStruct((BP, 1), jnp.float32),
        in_specs=[
            pl.BlockSpec((T * BP, I + 1), lambda: (0, 0)),
            pl.BlockSpec((I + 1, 4 * HP), lambda: (0, 0)),
            pl.BlockSpec((HP, 4 * HP), lambda: (0, 0)),
            pl.BlockSpec((1, HP), lambda: (0, 0)),
            pl.BlockSpec((1, 1), lambda: (0, 0)),
        ],
        out_specs=pl.BlockSpec((BP, 1), lambda: (0, 0)),
        scratch_shapes=[pltpu.VMEM((T * BP, 4 * HP), jnp.float32)],
    )(x_flat, wih_p, whh_p, wfc_p, bfc)

    return out_p[:B]


def model_forward_ref(x, params):
    """Pure-JAX reference of the PyTorch forward, for correctness check."""
    w_ih, w_hh, b_ih, b_hh, w_fc, b_fc = (params["w_ih"], params["w_hh"],
                                          params["b_ih"], params["b_hh"],
                                          params["w_fc"], params["b_fc"])
    B, T, I = x.shape
    H = w_hh.shape[1]
    h = jnp.zeros((B, H), jnp.float32)
    c = jnp.zeros((B, H), jnp.float32)
    for t in range(T):
        gates = x[:, t, :] @ w_ih.T + h @ w_hh.T + b_ih + b_hh
        i_g = jax.nn.sigmoid(gates[:, 0:H])
        f_g = jax.nn.sigmoid(gates[:, H:2 * H])
        g_g = jnp.tanh(gates[:, 2 * H:3 * H])
        o_g = jax.nn.sigmoid(gates[:, 3 * H:4 * H])
        c = f_g * c + i_g * g_g
        h = o_g * jnp.tanh(c)
    return h @ w_fc.T + b_fc


if __name__ == "__main__":
    # small shapes consistent with the module globals
    B, T = 2, 8
    input_size, hidden_size, output_size = 10, 64, 1

    key = jax.random.PRNGKey(0)
    ks = jax.random.split(key, 7)
    params = {
        # PyTorch parameter shapes: weight_ih_l0 (4H, I), weight_hh_l0 (4H, H),
        # bias_ih_l0 (4H,), bias_hh_l0 (4H,), fc.weight (O, H), fc.bias (O,)
        "w_ih": 0.1 * jax.random.normal(ks[0], (4 * hidden_size, input_size), jnp.float32),
        "w_hh": 0.1 * jax.random.normal(ks[1], (4 * hidden_size, hidden_size), jnp.float32),
        "b_ih": 0.1 * jax.random.normal(ks[2], (4 * hidden_size,), jnp.float32),
        "b_hh": 0.1 * jax.random.normal(ks[3], (4 * hidden_size,), jnp.float32),
        "w_fc": 0.1 * jax.random.normal(ks[4], (output_size, hidden_size), jnp.float32),
        "b_fc": 0.1 * jax.random.normal(ks[5], (output_size,), jnp.float32),
    }
    x = jax.random.normal(ks[6], (B, T, input_size), jnp.float32)

    out = jax.block_until_ready(model_forward(x, params))
    ref = jax.block_until_ready(model_forward_ref(x, params))

    assert out.shape == (B, output_size)
    assert jnp.allclose(out, ref, atol=1e-4, rtol=1e-4), (out, ref)
    print("KERNEL_OK")
</pallas_src>

<mosaic_0001>
module attributes {stable_mosaic.version = 11 : i64} {
  func.func @lstm_fc_kernel(%arg0: memref<64x11xf32, #tpu.memory_space<vmem>>, %arg1: memref<11x512xf32, #tpu.memory_space<vmem>>, %arg2: memref<128x512xf32, #tpu.memory_space<vmem>>, %arg3: memref<1x128xf32, #tpu.memory_space<vmem>>, %arg4: memref<1x1xf32, #tpu.memory_space<vmem>>, %arg5: memref<8x1xf32, #tpu.memory_space<vmem>>, %arg6: memref<64x512xf32, #tpu.memory_space<vmem>>) attributes {dimension_semantics = [], scalar_prefetch = 0 : i64, scratch_operands = 1 : i64, tpu.core_type = #tpu.core_type<tc>} {
    %c0 = arith.constant 0 : index
    %c0_0 = arith.constant 0 : index
    %0 = vector.load %arg0[%c0, %c0_0] : memref<64x11xf32, #tpu.memory_space<vmem>>, vector<64x11xf32>
    %c0_1 = arith.constant 0 : index
    %c0_2 = arith.constant 0 : index
    %1 = vector.load %arg1[%c0_1, %c0_2] : memref<11x512xf32, #tpu.memory_space<vmem>>, vector<11x512xf32>
    %cst = arith.constant dense<0.000000e+00> : vector<64x512xf32>
    %2 = tpu.matmul %0, %1, %cst {dimension_numbers = #tpu.dot_dimension_numbers<[1], [0], [0], [1], [0, 0, 1, 1], [], []>} : vector<64x11xf32>, vector<11x512xf32>, vector<64x512xf32> -> vector<64x512xf32>
    %c0_3 = arith.constant 0 : index
    %c0_4 = arith.constant 0 : index
    %3 = vector.load %arg6[%c0_3, %c0_4] : memref<64x512xf32, #tpu.memory_space<vmem>>, vector<64x512xf32>
    tpu.vector_store %arg6[%c0_3, %c0_4], %2 {strides = array<i32>} : memref<64x512xf32, #tpu.memory_space<vmem>>, vector<64x512xf32>,
    %4 = tpu.iota {dimensions = array<i32: 1>} : vector<8x512xi32>
    %c256_i32 = arith.constant 256 : i32
    %5 = vector.broadcast %c256_i32 : i32 to vector<8x512xi32>
    %6 = arith.cmpi sge, %4, %5 : vector<8x512xi32>
    %c384_i32 = arith.constant 384 : i32
    %7 = vector.broadcast %c384_i32 : i32 to vector<8x512xi32>
    %8 = arith.cmpi slt, %4, %7 : vector<8x512xi32>
    %9 = arith.andi %6, %8 : vector<8x512xi1>
    %cst_5 = arith.constant 1.000000e+00 : f32
    %cst_6 = arith.constant 5.000000e-01 : f32
    %10 = vector.broadcast %cst_5 : f32 to vector<8x512xf32>
    %11 = vector.broadcast %cst_6 : f32 to vector<8x512xf32>
    %12 = arith.select %9, %10, %11 : vector<8x512xi1>, vector<8x512xf32>
    %cst_7 = arith.constant 0.000000e+00 : f32
    %cst_8 = arith.constant 5.000000e-01 : f32
    %13 = vector.broadcast %cst_7 : f32 to vector<8x512xf32>
    %14 = vector.broadcast %cst_8 : f32 to vector<8x512xf32>
    %15 = arith.select %9, %13, %14 : vector<8x512xi1>, vector<8x512xf32>
    %cst_9 = arith.constant 0.000000e+00 : f32
    %16 = vector.broadcast %cst_9 : f32 to vector<8x128xf32>
    %cst_10 = arith.constant 0.000000e+00 : f32
    %17 = vector.broadcast %cst_10 : f32 to vector<8x128xf32>
    %c0_11 = arith.constant 0 : index
    %c0_12 = arith.constant 0 : index
    %18 = vector.load %arg6[%c0_11, %c0_12] : memref<64x512xf32, #tpu.memory_space<vmem>>, vector<8x512xf32>
    %c0_13 = arith.constant 0 : index
    %c0_14 = arith.constant 0 : index
    %19 = vector.load %arg2[%c0_13, %c0_14] : memref<128x512xf32, #tpu.memory_space<vmem>>, vector<128x512xf32>
    %cst_15 = arith.constant dense<0.000000e+00> : vector<8x512xf32>
    %20 = tpu.matmul %16, %19, %cst_15 {dimension_numbers = #tpu.dot_dimension_numbers<[1], [0], [0], [1], [0, 0, 1, 1], [], []>} : vector<8x128xf32>, vector<128x512xf32>, vector<8x512xf32> -> vector<8x512xf32>
    %21 = arith.addf %18, %20 : vector<8x512xf32>
    %22 = math.tanh %21 : vector<8x512xf32>
    %23 = arith.mulf %22, %12 : vector<8x512xf32>
    %24 = arith.addf %23, %15 : vector<8x512xf32>
    %25 = vector.extract_strided_slice %24 {offsets = [0, 0], sizes = [8, 128], strides = [1, 1]} : vector<8x512xf32> to vector<8x128xf32>
    %26 = vector.extract_strided_slice %24 {offsets = [0, 128], sizes = [8, 128], strides = [1, 1]} : vector<8x512xf32> to vector<8x128xf32>
    %27 = vector.extract_strided_slice %24 {offsets = [0, 256], sizes = [8, 128], strides = [1, 1]} : vector<8x512xf32> to vector<8x128xf32>
    %28 = vector.extract_strided_slice %24 {offsets = [0, 384], sizes = [8, 128], strides = [1, 1]} : vector<8x512xf32> to vector<8x128xf32>
    %29 = arith.mulf %26, %17 : vector<8x128xf32>
    %30 = arith.mulf %25, %27 : vector<8x128xf32>
    %31 = arith.addf %29, %30 : vector<8x128xf32>
    %32 = math.tanh %31 : vector<8x128xf32>
    %33 = arith.mulf %28, %32 : vector<8x128xf32>
    %c8 = arith.constant 8 : index
    %c0_16 = arith.constant 0 : index
    %34 = vector.load %arg6[%c8, %c0_16] : memref<64x512xf32, #tpu.memory_space<vmem>>, vector<8x512xf32>
    %c0_17 = arith.constant 0 : index
    %c0_18 = arith.constant 0 : index
    %35 = vector.load %arg2[%c0_17, %c0_18] : memref<128x512xf32, #tpu.memory_space<vmem>>, vector<128x512xf32>
    %cst_19 = arith.constant dense<0.000000e+00> : vector<8x512xf32>
    %36 = tpu.matmul %33, %35, %cst_19 {dimension_numbers = #tpu.dot_dimension_numbers<[1], [0], [0], [1], [0, 0, 1, 1], [], []>} : vector<8x128xf32>, vector<128x512xf32>, vector<8x512xf32> -> vector<8x512xf32>
    %37 = arith.addf %34, %36 : vector<8x512xf32>
    %38 = math.tanh %37 : vector<8x512xf32>
    %39 = arith.mulf %38, %12 : vector<8x512xf32>
    %40 = arith.addf %39, %15 : vector<8x512xf32>
    %41 = vector.extract_strided_slice %40 {offsets = [0, 0], sizes = [8, 128], strides = [1, 1]} : vector<8x512xf32> to vector<8x128xf32>
    %42 = vector.extract_strided_slice %40 {offsets = [0, 128], sizes = [8, 128], strides = [1, 1]} : vector<8x512xf32> to vector<8x128xf32>
    %43 = vector.extract_strided_slice %40 {offsets = [0, 256], sizes = [8, 128], strides = [1, 1]} : vector<8x512xf32> to vector<8x128xf32>
    %44 = vector.extract_strided_slice %40 {offsets = [0, 384], sizes = [8, 128], strides = [1, 1]} : vector<8x512xf32> to vector<8x128xf32>
    %45 = arith.mulf %42, %31 : vector<8x128xf32>
    %46 = arith.mulf %41, %43 : vector<8x128xf32>
    %47 = arith.addf %45, %46 : vector<8x128xf32>
    %48 = math.tanh %47 : vector<8x128xf32>
    %49 = arith.mulf %44, %48 : vector<8x128xf32>
    %c16 = arith.constant 16 : index
    %c0_20 = arith.constant 0 : index
    %50 = vector.load %arg6[%c16, %c0_20] : memref<64x512xf32, #tpu.memory_space<vmem>>, vector<8x512xf32>
    %c0_21 = arith.constant 0 : index
    %c0_22 = arith.constant 0 : index
    %51 = vector.load %arg2[%c0_21, %c0_22] : memref<128x512xf32, #tpu.memory_space<vmem>>, vector<128x512xf32>
    %cst_23 = arith.constant dense<0.000000e+00> : vector<8x512xf32>
    %52 = tpu.matmul %49, %51, %cst_23 {dimension_numbers = #tpu.dot_dimension_numbers<[1], [0], [0], [1], [0, 0, 1, 1], [], []>} : vector<8x128xf32>, vector<128x512xf32>, vector<8x512xf32> -> vector<8x512xf32>
    %53 = arith.addf %50, %52 : vector<8x512xf32>
    %54 = math.tanh %53 : vector<8x512xf32>
    %55 = arith.mulf %54, %12 : vector<8x512xf32>
    %56 = arith.addf %55, %15 : vector<8x512xf32>
    %57 = vector.extract_strided_slice %56 {offsets = [0, 0], sizes = [8, 128], strides = [1, 1]} : vector<8x512xf32> to vector<8x128xf32>
    %58 = vector.extract_strided_slice %56 {offsets = [0, 128], sizes = [8, 128], strides = [1, 1]} : vector<8x512xf32> to vector<8x128xf32>
    %59 = vector.extract_strided_slice %56 {offsets = [0, 256], sizes = [8, 128], strides = [1, 1]} : vector<8x512xf32> to vector<8x128xf32>
    %60 = vector.extract_strided_slice %56 {offsets = [0, 384], sizes = [8, 128], strides = [1, 1]} : vector<8x512xf32> to vector<8x128xf32>
    %61 = arith.mulf %58, %47 : vector<8x128xf32>
    %62 = arith.mulf %57, %59 : vector<8x128xf32>
    %63 = arith.addf %61, %62 : vector<8x128xf32>
    %64 = math.tanh %63 : vector<8x128xf32>
    %65 = arith.mulf %60, %64 : vector<8x128xf32>
    %c24 = arith.constant 24 : index
    %c0_24 = arith.constant 0 : index
    %66 = vector.load %arg6[%c24, %c0_24] : memref<64x512xf32, #tpu.memory_space<vmem>>, vector<8x512xf32>
    %c0_25 = arith.constant 0 : index
    %c0_26 = arith.constant 0 : index
    %67 = vector.load %arg2[%c0_25, %c0_26] : memref<128x512xf32, #tpu.memory_space<vmem>>, vector<128x512xf32>
    %cst_27 = arith.constant dense<0.000000e+00> : vector<8x512xf32>
    %68 = tpu.matmul %65, %67, %cst_27 {dimension_numbers = #tpu.dot_dimension_numbers<[1], [0], [0], [1], [0, 0, 1, 1], [], []>} : vector<8x128xf32>, vector<128x512xf32>, vector<8x512xf32> -> vector<8x512xf32>
    %69 = arith.addf %66, %68 : vector<8x512xf32>
    %70 = math.tanh %69 : vector<8x512xf32>
    %71 = arith.mulf %70, %12 : vector<8x512xf32>
    %72 = arith.addf %71, %15 : vector<8x512xf32>
    %73 = vector.extract_strided_slice %72 {offsets = [0, 0], sizes = [8, 128], strides = [1, 1]} : vector<8x512xf32> to vector<8x128xf32>
    %74 = vector.extract_strided_slice %72 {offsets = [0, 128], sizes = [8, 128], strides = [1, 1]} : vector<8x512xf32> to vector<8x128xf32>
    %75 = vector.extract_strided_slice %72 {offsets = [0, 256], sizes = [8, 128], strides = [1, 1]} : vector<8x512xf32> to vector<8x128xf32>
    %76 = vector.extract_strided_slice %72 {offsets = [0, 384], sizes = [8, 128], strides = [1, 1]} : vector<8x512xf32> to vector<8x128xf32>
    %77 = arith.mulf %74, %63 : vector<8x128xf32>
    %78 = arith.mulf %73, %75 : vector<8x128xf32>
    %79 = arith.addf %77, %78 : vector<8x128xf32>
    %80 = math.tanh %79 : vector<8x128xf32>
    %81 = arith.mulf %76, %80 : vector<8x128xf32>
    %c32 = arith.constant 32 : index
    %c0_28 = arith.constant 0 : index
    %82 = vector.load %arg6[%c32, %c0_28] : memref<64x512xf32, #tpu.memory_space<vmem>>, vector<8x512xf32>
    %c0_29 = arith.constant 0 : index
    %c0_30 = arith.constant 0 : index
    %83 = vector.load %arg2[%c0_29, %c0_30] : memref<128x512xf32, #tpu.memory_space<vmem>>, vector<128x512xf32>
    %cst_31 = arith.constant dense<0.000000e+00> : vector<8x512xf32>
    %84 = tpu.matmul %81, %83, %cst_31 {dimension_numbers = #tpu.dot_dimension_numbers<[1], [0], [0], [1], [0, 0, 1, 1], [], []>} : vector<8x128xf32>, vector<128x512xf32>, vector<8x512xf32> -> vector<8x512xf32>
    %85 = arith.addf %82, %84 : vector<8x512xf32>
    %86 = math.tanh %85 : vector<8x512xf32>
    %87 = arith.mulf %86, %12 : vector<8x512xf32>
    %88 = arith.addf %87, %15 : vector<8x512xf32>
    %89 = vector.extract_strided_slice %88 {offsets = [0, 0], sizes = [8, 128], strides = [1, 1]} : vector<8x512xf32> to vector<8x128xf32>
    %90 = vector.extract_strided_slice %88 {offsets = [0, 128], sizes = [8, 128], strides = [1, 1]} : vector<8x512xf32> to vector<8x128xf32>
    %91 = vector.extract_strided_slice %88 {offsets = [0, 256], sizes = [8, 128], strides = [1, 1]} : vector<8x512xf32> to vector<8x128xf32>
    %92 = vector.extract_strided_slice %88 {offsets = [0, 384], sizes = [8, 128], strides = [1, 1]} : vector<8x512xf32> to vector<8x128xf32>
    %93 = arith.mulf %90, %79 : vector<8x128xf32>
    %94 = arith.mulf %89, %91 : vector<8x128xf32>
    %95 = arith.addf %93, %94 : vector<8x128xf32>
    %96 = math.tanh %95 : vector<8x128xf32>
    %97 = arith.mulf %92, %96 : vector<8x128xf32>
    %c40 = arith.constant 40 : index
    %c0_32 = arith.constant 0 : index
    %98 = vector.load %arg6[%c40, %c0_32] : memref<64x512xf32, #tpu.memory_space<vmem>>, vector<8x512xf32>
    %c0_33 = arith.constant 0 : index
    %c0_34 = arith.constant 0 : index
    %99 = vector.load %arg2[%c0_33, %c0_34] : memref<128x512xf32, #tpu.memory_space<vmem>>, vector<128x512xf32>
    %cst_35 = arith.constant dense<0.000000e+00> : vector<8x512xf32>
    %100 = tpu.matmul %97, %99, %cst_35 {dimension_numbers = #tpu.dot_dimension_numbers<[1], [0], [0], [1], [0, 0, 1, 1], [], []>} : vector<8x128xf32>, vector<128x512xf32>, vector<8x512xf32> -> vector<8x512xf32>
    %101 = arith.addf %98, %100 : vector<8x512xf32>
    %102 = math.tanh %101 : vector<8x512xf32>
    %103 = arith.mulf %102, %12 : vector<8x512xf32>
    %104 = arith.addf %103, %15 : vector<8x512xf32>
    %105 = vector.extract_strided_slice %104 {offsets = [0, 0], sizes = [8, 128], strides = [1, 1]} : vector<8x512xf32> to vector<8x128xf32>
    %106 = vector.extract_strided_slice %104 {offsets = [0, 128], sizes = [8, 128], strides = [1, 1]} : vector<8x512xf32> to vector<8x128xf32>
    %107 = vector.extract_strided_slice %104 {offsets = [0, 256], sizes = [8, 128], strides = [1, 1]} : vector<8x512xf32> to vector<8x128xf32>
    %108 = vector.extract_strided_slice %104 {offsets = [0, 384], sizes = [8, 128], strides = [1, 1]} : vector<8x512xf32> to vector<8x128xf32>
    %109 = arith.mulf %106, %95 : vector<8x128xf32>
    %110 = arith.mulf %105, %107 : vector<8x128xf32>
    %111 = arith.addf %109, %110 : vector<8x128xf32>
    %112 = math.tanh %111 : vector<8x128xf32>
    %113 = arith.mulf %108, %112 : vector<8x128xf32>
    %c48 = arith.constant 48 : index
    %c0_36 = arith.constant 0 : index
    %114 = vector.load %arg6[%c48, %c0_36] : memref<64x512xf32, #tpu.memory_space<vmem>>, vector<8x512xf32>
    %c0_37 = arith.constant 0 : index
    %c0_38 = arith.constant 0 : index
    %115 = vector.load %arg2[%c0_37, %c0_38] : memref<128x512xf32, #tpu.memory_space<vmem>>, vector<128x512xf32>
    %cst_39 = arith.constant dense<0.000000e+00> : vector<8x512xf32>
    %116 = tpu.matmul %113, %115, %cst_39 {dimension_numbers = #tpu.dot_dimension_numbers<[1], [0], [0], [1], [0, 0, 1, 1], [], []>} : vector<8x128xf32>, vector<128x512xf32>, vector<8x512xf32> -> vector<8x512xf32>
    %117 = arith.addf %114, %116 : vector<8x512xf32>
    %118 = math.tanh %117 : vector<8x512xf32>
    %119 = arith.mulf %118, %12 : vector<8x512xf32>
    %120 = arith.addf %119, %15 : vector<8x512xf32>
    %121 = vector.extract_strided_slice %120 {offsets = [0, 0], sizes = [8, 128], strides = [1, 1]} : vector<8x512xf32> to vector<8x128xf32>
    %122 = vector.extract_strided_slice %120 {offsets = [0, 128], sizes = [8, 128], strides = [1, 1]} : vector<8x512xf32> to vector<8x128xf32>
    %123 = vector.extract_strided_slice %120 {offsets = [0, 256], sizes = [8, 128], strides = [1, 1]} : vector<8x512xf32> to vector<8x128xf32>
    %124 = vector.extract_strided_slice %120 {offsets = [0, 384], sizes = [8, 128], strides = [1, 1]} : vector<8x512xf32> to vector<8x128xf32>
    %125 = arith.mulf %122, %111 : vector<8x128xf32>
    %126 = arith.mulf %121, %123 : vector<8x128xf32>
    %127 = arith.addf %125, %126 : vector<8x128xf32>
    %128 = math.tanh %127 : vector<8x128xf32>
    %129 = arith.mulf %124, %128 : vector<8x128xf32>
    %c56 = arith.constant 56 : index
    %c0_40 = arith.constant 0 : index
    %130 = vector.load %arg6[%c56, %c0_40] : memref<64x512xf32, #tpu.memory_space<vmem>>, vector<8x512xf32>
    %c0_41 = arith.constant 0 : index
    %c0_42 = arith.constant 0 : index
    %131 = vector.load %arg2[%c0_41, %c0_42] : memref<128x512xf32, #tpu.memory_space<vmem>>, vector<128x512xf32>
    %cst_43 = arith.constant dense<0.000000e+00> : vector<8x512xf32>
    %132 = tpu.matmul %129, %131, %cst_43 {dimension_numbers = #tpu.dot_dimension_numbers<[1], [0], [0], [1], [0, 0, 1, 1], [], []>} : vector<8x128xf32>, vector<128x512xf32>, vector<8x512xf32> -> vector<8x512xf32>
    %133 = arith.addf %130, %132 : vector<8x512xf32>
    %134 = math.tanh %133 : vector<8x512xf32>
    %135 = arith.mulf %134, %12 : vector<8x512xf32>
    %136 = arith.addf %135, %15 : vector<8x512xf32>
    %137 = vector.extract_strided_slice %136 {offsets = [0, 0], sizes = [8, 128], strides = [1, 1]} : vector<8x512xf32> to vector<8x128xf32>
    %138 = vector.extract_strided_slice %136 {offsets = [0, 128], sizes = [8, 128], strides = [1, 1]} : vector<8x512xf32> to vector<8x128xf32>
    %139 = vector.extract_strided_slice %136 {offsets = [0, 256], sizes = [8, 128], strides = [1, 1]} : vector<8x512xf32> to vector<8x128xf32>
    %140 = vector.extract_strided_slice %136 {offsets = [0, 384], sizes = [8, 128], strides = [1, 1]} : vector<8x512xf32> to vector<8x128xf32>
    %141 = arith.mulf %138, %127 : vector<8x128xf32>
    %142 = arith.mulf %137, %139 : vector<8x128xf32>
    %143 = arith.addf %141, %142 : vector<8x128xf32>
    %144 = math.tanh %143 : vector<8x128xf32>
    %145 = arith.mulf %140, %144 : vector<8x128xf32>
    %c0_44 = arith.constant 0 : index
    %c0_45 = arith.constant 0 : index
    %146 = vector.load %arg3[%c0_44, %c0_45] : memref<1x128xf32, #tpu.memory_space<vmem>>, vector<1x128xf32>
    %147 = vector.broadcast %146 : vector<1x128xf32> to vector<8x128xf32>
    %148 = arith.mulf %145, %147 : vector<8x128xf32>
    %cst_46 = arith.constant dense<0.000000e+00> : vector<8xf32>
    %149 = vector.multi_reduction <add>, %148, %cst_46 [1] : vector<8x128xf32> to vector<8xf32>
    %150 = vector.shape_cast %149 : vector<8xf32> to vector<8x1xf32>
    %c0_47 = arith.constant 0 : index
    %c0_48 = arith.constant 0 : index
    %151 = vector.load %arg4[%c0_47, %c0_48] : memref<1x1xf32, #tpu.memory_space<vmem>>, vector<1x1xf32>
    %152 = vector.broadcast %151 : vector<1x1xf32> to vector<8x1xf32>
    %153 = arith.addf %150, %152 : vector<8x1xf32>
    %c0_49 = arith.constant 0 : index
    %c0_50 = arith.constant 0 : index
    %154 = vector.load %arg5[%c0_49, %c0_50] : memref<8x1xf32, #tpu.memory_space<vmem>>, vector<8x1xf32>
    tpu.vector_store %arg5[%c0_49, %c0_50], %153 {strides = array<i32>} : memref<8x1xf32, #tpu.memory_space<vmem>>, vector<8x1xf32>,
    return
  }
}

</mosaic_0001>

<bundles_post_ra>
// kernel: tpu_custom_call.1
= control target key start
LH: loop header
LB: loop body
LE: loop exit
PB: predicated region body
PF: predicated region fallthrough
CT: control target
= control target key end

     0   :  { %s3010_s0 = inlined_call_operand.vmem [shape: f32[64,11], index: 0, kind: input, shape index: {}]   ;;  %s3011_s1 = inlined_call_operand.vmem [shape: f32[11,512], index: 1, kind: input, shape index: {}]   ;;  %s3012_s2 = inlined_call_operand.hbm [shape: f32[128,512], index: 2, kind: input, shape index: {}]   ;;  %s3013_s3 = inlined_call_operand.vmem [shape: f32[1,128], index: 3, kind: input, shape index: {}]   ;;  %s3014_s4 = inlined_call_operand.<no memory space> [shape: f32[1,1], index: 4, kind: input, shape index: {}]   ;;  %s3015_s5 = inlined_call_operand.vmem [shape: f32[8,1], index: 5, kind: output, shape index: {}]  }
   0x1   :  { %v10_v0 = vstv %s3014_s4 }
   0x2   :  { %11 = vst [vmem:[#allocation3] sm:$0x1] %v10_v0 }
   0x3   :  { %12 = vsyncpa [#allocation5], 0  ;;  %s1990_s20 = smov [#allocation4]  }
   0x4   :  { %s22_s21 = sshll.u32 %s1990_s20, 4  ;;  %s23_s21 = int_to_ptr.vmem [resolvable:$true] %s22_s21 }
   0x5   :  { %s1976_s22 = scalar_lea.vmem %s23_s21, 8192  ;;  %p1981_p1 = scmp.lt.s32.totalorder %s23_s21, %s23_s21 }
   0x6   :  { %p1977_p0 = scmp.ne.s32.totalorder %s23_s21, %s1976_s22  ;;  %p1982_p2 = scmp.lt.s32.totalorder %s1976_s22, %s1976_s22 }
   0x8   :  { %p1983_p3 = por %p1982_p2, %p1981_p1 }
   0xa   :  { %p1984_p4 = pnand %p1983_p3, %p1977_p0 }
   0xc   :  { %1987 = shalt.err (!%p1984_p4)
}
   0xd   :  { %s1991_s23 = smov 512   ;;  %s1992_s24 = smov 32  }
   0xe   :  { %28 = dma.hbm_to_vmem [thread:$0]  %s3012_s2, 8192, %s23_s21, [#allocation5], %s1991_s23, %s1991_s23, %s1992_s24  }
   0xf   :  { %1988 = dma.done.wait [#allocation5], 8192  }
  0x10   :  { %1989 = vsyncadd [#allocation5], 4294959104  ;;  %v3016_v1 = vmov 0.0   ;;  %vm77_vm0 = vcmask 1042432   ;;  %v49_v2 = vld [vmem:[%s3011_s1 + $0x28] sm:$0x7] }
  0x11   :  { %154 = vmatprep.mubr.f32.mxu0 %v3016_v1  ;;  %267 = vmatprep.mubr.f32.mxu1 %v3016_v1  ;;  %v51_v3 = vld [vmem:[%s3011_s1 + $0x38] sm:$0x7]  ;;  %v48_v4 = vld [vmem:[%s3011_s1 + $0x20] sm:$0x7]  ;;  %v50_v5 = vld [vmem:[%s3011_s1 + $0x30] sm:$0x7] }
  0x12   :  { %1798 = vmatprep.subr.msk.mxu0 %vm77_vm0, %v49_v2  ;;  %1808 = vmatprep.subr.msk.mxu1 %vm77_vm0, %v51_v3  ;;  %v45_v6 = vld [vmem:[%s3011_s1 + $0x8] sm:$0xff]  ;;  %v47_v7 = vld [vmem:[%s3011_s1 + $0x18] sm:$0xff]  ;;  %v44_v8 = vld [vmem:[%s3011_s1] sm:$0xff]  ;;  %vm52_vm1 = vcmask 89088   ;;  %vm1791_vm2 = vcmask 7168  }
  0x13   :  { %1799 = vmatpush1.msk.msra.mxu0 %vm77_vm0, %v48_v4  ;;  %1809 = vmatpush1.msk.msra.mxu1 %vm77_vm0, %v50_v5  ;;  %v46_v9 = vld [vmem:[%s3011_s1 + $0x10] sm:$0xff]  ;;  %v36_v10 = vld [vmem:[%s3010_s0] sm:$0xff]  ;;  %v37_v19 = vld [vmem:[%s3010_s0 + $0x8] sm:$0xff] }
  0x14   :  { %120 = vmatprep.subr.mxu0 %v45_v6  ;;  %233 = vmatprep.subr.mxu1 %v47_v7  ;;  %v2059_v11 = vld [vmem:[#allocation4 + $0x1e8] sm:$0xff]  ;;  %v2061_v12 = vld [vmem:[#allocation4 + $0x1f8] sm:$0xff]  ;;  %v2063_v13 = vld [vmem:[#allocation4 + $0x1e0] sm:$0xff] }
  0x15   :  { %3089 = vst [vmem:[#allocation7_spill] sm:$0xff] %v2059_v11  ;;  %3090 = vst [vmem:[#allocation8_spill] sm:$0xff] %v2061_v12  ;;  %121 = vmatpush1.msra.mxu0 %v44_v8  ;;  %234 = vmatpush1.msra.mxu1 %v46_v9  ;;  %v2065_v14 = vld [vmem:[#allocation4 + $0x1f0] sm:$0xff]  ;;  %v2069_v15 = vld [vmem:[#allocation4 + $0x1c8] sm:$0xff] }
  0x16   :  { %1800 = vmatmul.mubr.msk.f32.vlgmr.msra.gmra.mxu0 %vm52_vm1, %v36_v10  ;;  %1810 = vmatmul.mubr.msk.f32.vlgmr.msra.gmra.mxu1 %vm52_vm1, %v36_v10  ;;  %v2071_v16 = vld [vmem:[#allocation4 + $0x1d8] sm:$0xff]  ;;  %v2077_v17 = vld [vmem:[#allocation4 + $0x1c0] sm:$0xff]  ;;  %v2079_v18 = vld [vmem:[#allocation4 + $0x1d0] sm:$0xff] }
  0x17   :  { %441 = vmatprep.subr.mxu0 %v2059_v11  ;;  %512 = vmatprep.subr.mxu1 %v2061_v12  ;;  %v2088_v20 = vld [vmem:[#allocation4 + $0x1a8] sm:$0xff]  ;;  %v2090_v21 = vld [vmem:[#allocation4 + $0x1b8] sm:$0xff]  ;;  %v2094_v22 = vld [vmem:[#allocation4 + $0x1a0] sm:$0xff] }
  0x18   :  { %442 = vmatpush1.msra.mxu0 %v2063_v13  ;;  %513 = vmatpush1.msra.mxu1 %v2065_v14  ;;  %v2096_v23 = vld [vmem:[#allocation4 + $0x1b0] sm:$0xff]  ;;  %v2100_v24 = vld [vmem:[#allocation4 + $0x188] sm:$0xff]  ;;  %v2102_v25 = vld [vmem:[#allocation4 + $0x198] sm:$0xff] }
  0x19   :  { %443 = vmatprep.subr.mxu0 %v2069_v15  ;;  %514 = vmatprep.subr.mxu1 %v2071_v16  ;;  %v2108_v26 = vld [vmem:[#allocation4 + $0x180] sm:$0xff]  ;;  %v2110_v27 = vld [vmem:[#allocation4 + $0x190] sm:$0xff]  ;;  %v2119_v29 = vld [vmem:[#allocation4 + $0x168] sm:$0xff] }
  0x1a   :  { %160 = vmatprep.mubr.f32.mxu0 %v3016_v1  ;;  %273 = vmatprep.mubr.f32.mxu1 %v3016_v1  ;;  %v38_v28 = vld [vmem:[%s3010_s0 + $0x10] sm:$0xff]  ;;  %v2121_v30 = vld [vmem:[#allocation4 + $0x178] sm:$0xff]  ;;  %v2125_v31 = vld [vmem:[#allocation4 + $0x160] sm:$0xff] }
  0x1b   :  { %444 = vmatpush1.msra.mxu0 %v2077_v17  ;;  %515 = vmatpush1.msra.mxu1 %v2079_v18  ;;  %v2127_v32 = vld [vmem:[#allocation4 + $0x170] sm:$0xff]  ;;  %v2131_v33 = vld [vmem:[#allocation4 + $0x148] sm:$0xff]  ;;  %v2133_v34 = vld [vmem:[#allocation4 + $0x158] sm:$0xff] }
  0x1c   :  { %1801 = vmatmul.mubr.msk.f32.gmra.mxu0 %vm52_vm1, %v37_v19  ;;  %1811 = vmatmul.mubr.msk.f32.gmra.mxu1 %vm52_vm1, %v37_v19  ;;  %v2139_v35 = vld [vmem:[#allocation4 + $0x140] sm:$0xff]  ;;  %v2141_v36 = vld [vmem:[#allocation4 + $0x150] sm:$0xff]  ;;  %v2150_v38 = vld [vmem:[#allocation4 + $0x128] sm:$0xff] }
  0x1d   :  { %445 = vmatprep.subr.mxu0 %v2088_v20  ;;  %516 = vmatprep.subr.mxu1 %v2090_v21  ;;  %v39_v37 = vld [vmem:[%s3010_s0 + $0x18] sm:$0xff]  ;;  %v2156_v40 = vld [vmem:[#allocation4 + $0x120] sm:$0xff]  ;;  %v2162_v42 = vld [vmem:[#allocation4 + $0x108] sm:$0xff] }
  0x1e   :  { %446 = vmatpush1.msra.mxu0 %v2094_v22  ;;  %517 = vmatpush1.msra.mxu1 %v2096_v23  ;;  %v2152_v39 = vld [vmem:[#allocation4 + $0x138] sm:$0xff]  ;;  %v2158_v41 = vld [vmem:[#allocation4 + $0x130] sm:$0xff]  ;;  %v2170_v44 = vld [vmem:[#allocation4 + $0x100] sm:$0xff] }
  0x1f   :  { %447 = vmatprep.subr.mxu0 %v2100_v24  ;;  %518 = vmatprep.subr.mxu1 %v2102_v25  ;;  %v2164_v43 = vld [vmem:[#allocation4 + $0x118] sm:$0xff]  ;;  %v2172_v45 = vld [vmem:[#allocation4 + $0x110] sm:$0xff]  ;;  %v2181_v47 = vld [vmem:[#allocation4 + $0xe8] sm:$0xff] }
  0x20   :  { %166 = vmatprep.mubr.f32.mxu0 %v3016_v1  ;;  %279 = vmatprep.mubr.f32.mxu1 %v3016_v1  ;;  %v40_v46 = vld [vmem:[%s3010_s0 + $0x20] sm:$0xff]  ;;  %v2189_v50 = vld [vmem:[#allocation4 + $0xf0] sm:$0xff]  ;;  %v2193_v51 = vld [vmem:[#allocation4 + $0xc8] sm:$0xff] }
  0x21   :  { %448 = vmatpush1.msra.mxu0 %v2108_v26  ;;  %519 = vmatpush1.msra.mxu1 %v2110_v27  ;;  %v2183_v48 = vld [vmem:[#allocation4 + $0xf8] sm:$0xff]  ;;  %v2187_v49 = vld [vmem:[#allocation4 + $0xe0] sm:$0xff]  ;;  %v2203_v54 = vld [vmem:[#allocation4 + $0xd0] sm:$0xff] }
  0x22   :  { %1802 = vmatmul.mubr.msk.f32.gmra.mxu0 %vm52_vm1, %v38_v28  ;;  %1812 = vmatmul.mubr.msk.f32.gmra.mxu1 %vm52_vm1, %v38_v28  ;;  %v2195_v52 = vld [vmem:[#allocation4 + $0xd8] sm:$0xff]  ;;  %v2201_v53 = vld [vmem:[#allocation4 + $0xc0] sm:$0xff]  ;;  %v2212_v56 = vld [vmem:[#allocation4 + $0xa8] sm:$0xff] }
  0x23   :  { %449 = vmatprep.subr.mxu0 %v2119_v29  ;;  %520 = vmatprep.subr.mxu1 %v2121_v30  ;;  %v41_v55 = vld [vmem:[%s3010_s0 + $0x28] sm:$0xff]  ;;  %v2214_v57 = vld [vmem:[#allocation4 + $0xb8] sm:$0xff]  ;;  %v2220_v59 = vld [vmem:[#allocation4 + $0xb0] sm:$0xff] }
  0x24   :  { %450 = vmatpush1.msra.mxu0 %v2125_v31  ;;  %521 = vmatpush1.msra.mxu1 %v2127_v32  ;;  %v2218_v58 = vld [vmem:[#allocation4 + $0xa0] sm:$0xff]  ;;  %v2224_v60 = vld [vmem:[#allocation4 + $0x88] sm:$0xff]  ;;  %v2226_v61 = vld [vmem:[#allocation4 + $0x98] sm:$0xff] }
  0x25   :  { %451 = vmatprep.subr.mxu0 %v2131_v33  ;;  %522 = vmatprep.subr.mxu1 %v2133_v34  ;;  %3091 = vst [vmem:[#allocation9_spill] sm:$0xff] %v2224_v60  ;;  %v2232_v62 = vld [vmem:[#allocation4 + $0x80] sm:$0xff]  ;;  %v2234_v63 = vld [vmem:[#allocation4 + $0x90] sm:$0xff]  ;;  %v2243_v2 = vld [vmem:[#allocation4 + $0x68] sm:$0xff] }
  0x26   :  { %172 = vmatprep.mubr.f32.mxu0 %v3016_v1  ;;  %285 = vmatprep.mubr.f32.mxu1 %v3016_v1  ;;  %3092 = vst [vmem:[#allocation10_spill] sm:$0xff] %v2232_v62  ;;  %3093 = vst [vmem:[#allocation11_spill] sm:$0xff] %v2234_v63  ;;  %v42_v0 = vld [vmem:[%s3010_s0 + $0x30] sm:$0xff]  ;;  %v2245_v3 = vld [vmem:[#allocation4 + $0x78] sm:$0xff] }
  0x27   :  { %452 = vmatpush1.msra.mxu0 %v2139_v35  ;;  %523 = vmatpush1.msra.mxu1 %v2141_v36  ;;  %3094 = vst [vmem:[#allocation12_spill] sm:$0xff] %v2243_v2  ;;  %3095 = vst [vmem:[#allocation13_spill] sm:$0xff] %v2245_v3  ;;  %v2249_v4 = vld [vmem:[#allocation4 + $0x60] sm:$0xff]  ;;  %v2251_v5 = vld [vmem:[#allocation4 + $0x70] sm:$0xff] }
  0x28   :  { %1803 = vmatmul.mubr.msk.f32.gmra.mxu0 %vm52_vm1, %v39_v37  ;;  %1813 = vmatmul.mubr.msk.f32.gmra.mxu1 %vm52_vm1, %v39_v37  ;;  %3096 = vst [vmem:[#allocation14_spill] sm:$0xff] %v2249_v4  ;;  %3097 = vst [vmem:[#allocation15_spill] sm:$0xff] %v2251_v5  ;;  %v2255_v6 = vld [vmem:[#allocation4 + $0x48] sm:$0xff]  ;;  %v2257_v7 = vld [vmem:[#allocation4 + $0x58] sm:$0xff] }
  0x29   :  { %453 = vmatprep.subr.mxu0 %v2150_v38  ;;  %524 = vmatprep.subr.mxu1 %v2152_v39  ;;  %3098 = vst [vmem:[#allocation16_spill] sm:$0xff] %v2255_v6  ;;  %3099 = vst [vmem:[#allocation17_spill] sm:$0xff] %v2257_v7  ;;  %v2263_v8 = vld [vmem:[#allocation4 + $0x40] sm:$0xff]  ;;  %v2265_v9 = vld [vmem:[#allocation4 + $0x50] sm:$0xff] }
  0x2a   :  { %454 = vmatpush1.msra.mxu0 %v2156_v40  ;;  %525 = vmatpush1.msra.mxu1 %v2158_v41  ;;  %3100 = vst [vmem:[#allocation18_spill] sm:$0xff] %v2263_v8  ;;  %3101 = vst [vmem:[#allocation19_spill] sm:$0xff] %v2265_v9  ;;  %v43_v10 = vld [vmem:[%s3010_s0 + $0x38] sm:$0xff]  ;;  %v2274_v19 = vld [vmem:[#allocation4 + $0x28] sm:$0xff] }
  0x2b   :  { %455 = vmatprep.subr.mxu0 %v2162_v42  ;;  %526 = vmatprep.subr.mxu1 %v2164_v43  ;;  %3102 = vst [vmem:[#allocation20_spill] sm:$0xff] %v2274_v19  ;;  %v2276_v28 = vld [vmem:[#allocation4 + $0x38] sm:$0xff]  ;;  %v2280_v37 = vld [vmem:[#allocation4 + $0x20] sm:$0xff] }
  0x2c   :  { %178 = vmatprep.mubr.f32.mxu0 %v3016_v1  ;;  %291 = vmatprep.mubr.f32.mxu1 %v3016_v1  ;;  %3103 = vst [vmem:[#allocation21_spill] sm:$0xff] %v2276_v28  ;;  %3104 = vst [vmem:[#allocation22_spill] sm:$0xff] %v2280_v37 }
  0x2d   :  { %456 = vmatpush1.msra.mxu0 %v2170_v44  ;;  %527 = vmatpush1.msra.mxu1 %v2172_v45 }
  0x2e   :  { %1804 = vmatmul.mubr.msk.f32.gmra.mxu0 %vm52_vm1, %v40_v46  ;;  %1814 = vmatmul.mubr.msk.f32.gmra.mxu1 %vm52_vm1, %v40_v46  ;;  %v2282_v46 = vld [vmem:[#allocation4 + $0x30] sm:$0xff] }
  0x2f   :  { %457 = vmatprep.subr.mxu0 %v2181_v47  ;;  %528 = vmatprep.subr.mxu1 %v2183_v48  ;;  %3105 = vst [vmem:[#allocation23_spill] sm:$0xff] %v2282_v46 }
  0x30   :  { %458 = vmatpush1.msra.mxu0 %v2187_v49  ;;  %529 = vmatpush1.msra.mxu1 %v2189_v50 }
  0x31   :  { %459 = vmatprep.subr.mxu0 %v2193_v51  ;;  %530 = vmatprep.subr.mxu1 %v2195_v52 }
  0x32   :  { %184 = vmatprep.mubr.f32.mxu0 %v3016_v1  ;;  %297 = vmatprep.mubr.f32.mxu1 %v3016_v1 }
  0x33   :  { %460 = vmatpush1.msra.mxu0 %v2201_v53  ;;  %531 = vmatpush1.msra.mxu1 %v2203_v54 }
  0x34   :  { %1805 = vmatmul.mubr.msk.f32.gmra.mxu0 %vm52_vm1, %v41_v55  ;;  %1815 = vmatmul.mubr.msk.f32.gmra.mxu1 %vm52_vm1, %v41_v55  ;;  %v2286_v55 = vld [vmem:[#allocation4 + $0x8] sm:$0xff] }
  0x35   :  { %461 = vmatprep.subr.mxu0 %v2212_v56  ;;  %532 = vmatprep.subr.mxu1 %v2214_v57  ;;  %3106 = vst [vmem:[#allocation24_spill] sm:$0xff] %v2286_v55 }
  0x36   :  { %462 = vmatpush1.msra.mxu0 %v2218_v58  ;;  %533 = vmatpush1.msra.mxu1 %v2220_v59 }
  0x37   :  { %463 = vmatprep.subr.mxu0 %v2224_v60  ;;  %534 = vmatprep.subr.mxu1 %v2226_v61 }
  0x38   :  { %190 = vmatprep.mubr.f32.mxu0 %v3016_v1  ;;  %303 = vmatprep.mubr.f32.mxu1 %v3016_v1 }
  0x39   :  { %464 = vmatpush1.msra.mxu0 %v2232_v62  ;;  %535 = vmatpush1.msra.mxu1 %v2234_v63 }
  0x3a   :  { %1806 = vmatmul.mubr.msk.f32.gmra.mxu0 %vm52_vm1, %v42_v0  ;;  %1816 = vmatmul.mubr.msk.f32.gmra.mxu1 %vm52_vm1, %v42_v0  ;;  %v2288_v0 = vld [vmem:[#allocation4 + $0x18] sm:$0xff] }
  0x3b   :  { %465 = vmatprep.subr.mxu0 %v2243_v2  ;;  %536 = vmatprep.subr.mxu1 %v2245_v3  ;;  %3107 = vst [vmem:[#allocation25_spill] sm:$0xff] %v2288_v0 }
  0x3c   :  { %466 = vmatpush1.msra.mxu0 %v2249_v4  ;;  %537 = vmatpush1.msra.mxu1 %v2251_v5 }
  0x3d   :  { %467 = vmatprep.subr.mxu0 %v2255_v6  ;;  %538 = vmatprep.subr.mxu1 %v2257_v7 }
  0x3e   :  { %196 = vmatprep.mubr.f32.mxu0 %v3016_v1  ;;  %309 = vmatprep.mubr.f32.mxu1 %v3016_v1  ;;  %v2292_v1 = vld [vmem:[#allocation4] sm:$0xff] }
  0x3f   :  { %468 = vmatpush1.msra.mxu0 %v2263_v8  ;;  %539 = vmatpush1.msra.mxu1 %v2265_v9  ;;  %3108 = vst [vmem:[#allocation26_spill] sm:$0xff] %v2292_v1  ;;  %v2296_v9 = vld [vmem:[#allocation4 + $0x10] sm:$0xff] }
  0x40   :  { %1807 = vmatmul.mubr.msk.f32.gmra.mxu0 %vm52_vm1, %v43_v10  ;;  %1817 = vmatmul.mubr.msk.f32.gmra.mxu1 %vm52_vm1, %v43_v10  ;;  %3109 = vst [vmem:[#allocation27_spill] sm:$0xff] %v2296_v9  ;;  %v3110_v10 = vmov 0.0  }
  0x41   :  { %469 = vmatprep.subr.mxu0 %v2274_v19  ;;  %540 = vmatprep.subr.mxu1 %v2276_v28 }
  0x42   :  { %470 = vmatpush1.msra.mxu0 %v2280_v37  ;;  %541 = vmatpush1.msra.mxu1 %v2282_v46 }
  0x43   :  { %471 = vmatprep.subr.mxu0 %v2286_v55  ;;  %542 = vmatprep.subr.mxu1 %v2288_v0 }
  0x44   :  { %472 = vmatpush1.msra.mxu0 %v2292_v1  ;;  %505 = vmatprep.mubr.f32.mxu0 %v3110_v10 }
  0x45   :  { %543 = vmatpush1.msra.mxu1 %v2296_v9  ;;  %576 = vmatprep.mubr.f32.mxu1 %v3110_v10 }
  0x46   :  { %506 = vmatmul.mubr.f32.vlgmr.msra.gmra.mxu0 %v3110_v10  ;;  %577 = vmatmul.mubr.f32.vlgmr.msra.gmra.mxu1 %v3110_v10 }
  0x47   :  { %608 = vmatprep.subr.mxu0 %v2059_v11  ;;  %679 = vmatprep.subr.mxu1 %v2061_v12 }
  0x48   :  { %609 = vmatpush1.msra.mxu0 %v2063_v13  ;;  %680 = vmatpush1.msra.mxu1 %v2065_v14 }
  0x49   :  { %610 = vmatprep.subr.mxu0 %v2069_v15  ;;  %681 = vmatprep.subr.mxu1 %v2071_v16 }
  0x4a   :  { %611 = vmatpush1.msra.mxu0 %v2077_v17  ;;  %682 = vmatpush1.msra.mxu1 %v2079_v18 }
  0x4b   :  { %612 = vmatprep.subr.mxu0 %v2088_v20  ;;  %683 = vmatprep.subr.mxu1 %v2090_v21 }
  0x4c   :  { %613 = vmatpush1.msra.mxu0 %v2094_v22  ;;  %684 = vmatpush1.msra.mxu1 %v2096_v23 }
  0x4d   :  { %614 = vmatprep.subr.mxu0 %v2100_v24  ;;  %685 = vmatprep.subr.mxu1 %v2102_v25 }
  0x4e   :  { %615 = vmatpush1.msra.mxu0 %v2108_v26  ;;  %686 = vmatpush1.msra.mxu1 %v2110_v27 }
  0x4f   :  { %616 = vmatprep.subr.mxu0 %v2119_v29  ;;  %687 = vmatprep.subr.mxu1 %v2121_v30 }
  0x50   :  { %617 = vmatpush1.msra.mxu0 %v2125_v31  ;;  %688 = vmatpush1.msra.mxu1 %v2127_v32 }
  0x51   :  { %618 = vmatprep.subr.mxu0 %v2131_v33  ;;  %689 = vmatprep.subr.mxu1 %v2133_v34 }
  0x52   :  { %619 = vmatpush1.msra.mxu0 %v2139_v35  ;;  %690 = vmatpush1.msra.mxu1 %v2141_v36 }
  0x53   :  { %620 = vmatprep.subr.mxu0 %v2150_v38  ;;  %691 = vmatprep.subr.mxu1 %v2152_v39 }
  0x54   :  { %621 = vmatpush1.msra.mxu0 %v2156_v40  ;;  %692 = vmatpush1.msra.mxu1 %v2158_v41 }
  0x55   :  { %622 = vmatprep.subr.mxu0 %v2162_v42  ;;  %693 = vmatprep.subr.mxu1 %v2164_v43 }
  0x56   :  { %623 = vmatpush1.msra.mxu0 %v2170_v44  ;;  %694 = vmatpush1.msra.mxu1 %v2172_v45 }
  0x57   :  { %624 = vmatprep.subr.mxu0 %v2181_v47  ;;  %695 = vmatprep.subr.mxu1 %v2183_v48 }
  0x58   :  { %625 = vmatpush1.msra.mxu0 %v2187_v49  ;;  %696 = vmatpush1.msra.mxu1 %v2189_v50 }
  0x59   :  { %626 = vmatprep.subr.mxu0 %v2193_v51  ;;  %697 = vmatprep.subr.mxu1 %v2195_v52 }
  0x5a   :  { %627 = vmatpush1.msra.mxu0 %v2201_v53  ;;  %698 = vmatpush1.msra.mxu1 %v2203_v54 }
  0x5b   :  { %628 = vmatprep.subr.mxu0 %v2212_v56  ;;  %699 = vmatprep.subr.mxu1 %v2214_v57 }
  0x5c   :  { %629 = vmatpush1.msra.mxu0 %v2218_v58  ;;  %700 = vmatpush1.msra.mxu1 %v2220_v59 }
  0x5d   :  { %630 = vmatprep.subr.mxu0 %v2224_v60  ;;  %701 = vmatprep.subr.mxu1 %v2226_v61  ;;  %v3111_v60 = vld [vmem:[#allocation19_spill] sm:$0xff] }
  0x5e   :  { %631 = vmatpush1.msra.mxu0 %v2232_v62  ;;  %702 = vmatpush1.msra.mxu1 %v2234_v63 }
  0x5f   :  { %632 = vmatprep.subr.mxu0 %v2243_v2  ;;  %703 = vmatprep.subr.mxu1 %v2245_v3 }
  0x60   :  { %633 = vmatpush1.msra.mxu0 %v2249_v4  ;;  %704 = vmatpush1.msra.mxu1 %v2251_v5 }
  0x61   :  { %634 = vmatprep.subr.mxu0 %v2255_v6  ;;  %705 = vmatprep.subr.mxu1 %v2257_v7 }
  0x62   :  { %635 = vmatpush1.msra.mxu0 %v2263_v8  ;;  %706 = vmatpush1.msra.mxu1 %v3111_v60 }
  0x63   :  { %636 = vmatprep.subr.mxu0 %v2274_v19  ;;  %707 = vmatprep.subr.mxu1 %v2276_v28 }
  0x64   :  { %637 = vmatpush1.msra.mxu0 %v2280_v37  ;;  %708 = vmatpush1.msra.mxu1 %v2282_v46 }
  0x65   :  { %638 = vmatprep.subr.mxu0 %v2286_v55  ;;  %709 = vmatprep.subr.mxu1 %v2288_v0 }
  0x66   :  { %639 = vmatpush1.msra.mxu0 %v2292_v1  ;;  %672 = vmatprep.mubr.f32.mxu0 %v3110_v10 }
  0x67   :  { %710 = vmatpush1.msra.mxu1 %v2296_v9  ;;  %743 = vmatprep.mubr.f32.mxu1 %v3110_v10 }
  0x68   :  { %775 = vmatprep.subr.mxu0 %v2059_v11  ;;  %846 = vmatprep.subr.mxu1 %v2061_v12 }
  0xd6   :  { %v156_v28 = vpop.f32.mrf.mxu0  ;;  %v269_v37 = vpop.f32.mrf.mxu1 }
  0xd8   :  { %v158_v19 = vpop.f32.mrf.mxu0  ;;  %v271_v46 = vpop.f32.mrf.mxu1 }
  0xdc   :  { %v2374_v60 = vpop.f32.mrf.mxu0  ;;  %v2376_v55 = vpop.f32.mrf.mxu1 }
  0xdd   :  { %3112 = vst [vmem:[#allocation28_spill] sm:$0xff] %v2374_v60  ;;  %3113 = vst [vmem:[#allocation29_spill] sm:$0xff] %v2376_v55 }
  0xde   :  { %v2378_v0 = vpop.f32.mrf.mxu0  ;;  %v2380_v1 = vpop.f32.mrf.mxu1 }
  0xdf   :  { %3114 = vst [vmem:[#allocation30_spill] sm:$0xff] %v2378_v0  ;;  %3115 = vst [vmem:[#allocation31_spill] sm:$0xff] %v2380_v1 }
  0xe2   :  { %v2382_v8 = vpop.f32.mrf.mxu0  ;;  %v2384_v9 = vpop.f32.mrf.mxu1 }
  0xe3   :  { %3116 = vst [vmem:[#allocation32_spill] sm:$0xff] %v2382_v8  ;;  %3117 = vst [vmem:[#allocation33_spill] sm:$0xff] %v2384_v9 }
  0xe4   :  { %v2386_v10 = vpop.f32.mrf.mxu0  ;;  %v2388_v11 = vpop.f32.mrf.mxu1 }
  0xe5   :  { %3118 = vst [vmem:[#allocation34_spill] sm:$0xff] %v2386_v10  ;;  %3119 = vst [vmem:[#allocation35_spill] sm:$0xff] %v2388_v11 }
  0xe8   :  { %v2390_v12 = vpop.f32.mrf.mxu0  ;;  %v2392_v7 = vpop.f32.mrf.mxu1 }
  0xe9   :  { %3120 = vst [vmem:[#allocation36_spill] sm:$0xff] %v2390_v12  ;;  %3121 = vst [vmem:[#allocation37_spill] sm:$0xff] %v2392_v7 }
  0xea   :  { %v2394_v6 = vpop.f32.mrf.mxu0  ;;  %v2396_v60 = vpop.f32.mrf.mxu1 }
  0xeb   :  { %3122 = vst [vmem:[#allocation38_spill] sm:$0xff] %v2394_v6  ;;  %3123 = vst [vmem:[#allocation39_spill] sm:$0xff] %v2396_v60 }
  0xee   :  { %v2398_v55 = vpop.f32.mrf.mxu0  ;;  %v2400_v0 = vpop.f32.mrf.mxu1 }
  0xef   :  { %3124 = vst [vmem:[#allocation40_spill] sm:$0xff] %v2398_v55  ;;  %3125 = vst [vmem:[#allocation41_spill] sm:$0xff] %v2400_v0 }
  0xf0   :  { %v2402_v1 = vpop.f32.mrf.mxu0  ;;  %v2404_v8 = vpop.f32.mrf.mxu1 }
  0xf1   :  { %3126 = vst [vmem:[#allocation42_spill] sm:$0xff] %v2402_v1  ;;  %3127 = vst [vmem:[#allocation43_spill] sm:$0xff] %v2404_v8 }
  0xf4   :  { %v2406_v9 = vpop.f32.mrf.mxu0  ;;  %v2408_v10 = vpop.f32.mrf.mxu1 }
  0xf5   :  { %3128 = vst [vmem:[#allocation44_spill] sm:$0xff] %v2406_v9  ;;  %3129 = vst [vmem:[#allocation45_spill] sm:$0xff] %v2408_v10 }
  0xf6   :  { %v2410_v11 = vpop.f32.mrf.mxu0  ;;  %v2412_v12 = vpop.f32.mrf.mxu1 }
  0xf7   :  { %3130 = vst [vmem:[#allocation46_spill] sm:$0xff] %v2410_v11  ;;  %3131 = vst [vmem:[#allocation47_spill] sm:$0xff] %v2412_v12 }
  0xfa   :  { %v2414_v7 = vpop.f32.mrf.mxu0  ;;  %v2416_v6 = vpop.f32.mrf.mxu1 }
  0xfb   :  { %3132 = vst [vmem:[#allocation48_spill] sm:$0xff] %v2414_v7  ;;  %3133 = vst [vmem:[#allocation49_spill] sm:$0xff] %v2416_v6 }
  0xfc   :  { %v2418_v60 = vpop.f32.mrf.mxu0  ;;  %v2420_v55 = vpop.f32.mrf.mxu1 }
  0xfd   :  { %3134 = vst [vmem:[#allocation50_spill] sm:$0xff] %v2418_v60  ;;  %3135 = vst [vmem:[#allocation51_spill] sm:$0xff] %v2420_v55 }
 0x100   :  { %v2422_v0 = vpop.f32.mrf.mxu0  ;;  %v2424_v1 = vpop.f32.mrf.mxu1 }
 0x101   :  { %3136 = vst [vmem:[#allocation52_spill] sm:$0xff] %v2422_v0  ;;  %3137 = vst [vmem:[#allocation53_spill] sm:$0xff] %v2424_v1 }
 0x102   :  { %v2426_v8 = vpop.f32.mrf.mxu0  ;;  %v2428_v9 = vpop.f32.mrf.mxu1 }
 0x103   :  { %3138 = vst [vmem:[#allocation54_spill] sm:$0xff] %v2426_v8  ;;  %3139 = vst [vmem:[#allocation55_spill] sm:$0xff] %v2428_v9 }
 0x106   :  { %v507_v10 = vpop.f32.mrf.mxu0  ;;  %v578_v5 = vpop.f32.mrf.mxu1 }
 0x107   :  { %v583_v11 = vadd.f32 %v507_v10, %v156_v28  ;;  %v585_v4 = vadd.f32 %v578_v5, %v269_v37  ;;  %v3150_v37 = vld [vmem:[#allocation19_spill] sm:$0xff] }
 0x108   :  { %v509_v12 = vpop.f32.mrf.mxu0  ;;  %v580_v6 = vpop.f32.mrf.mxu1  ;;  %v3154_v10 = vld [vmem:[#allocation23_spill] sm:$0xff] }
 0x109   :  { %1824 = vtanh.f32 %v583_v11  ;;  %v584_v7 = vadd.f32 %v509_v12, %v158_v19  ;;  %v586_v60 = vadd.f32 %v580_v6, %v271_v46  ;;  %v3146_v6 = vld [vmem:[#allocation15_spill] sm:$0xff]  ;;  %v3149_v19 = vld [vmem:[#allocation18_spill] sm:$0xff]  ;;  %v3151_v46 = vld [vmem:[#allocation20_spill] sm:$0xff] }
 0x10b   :  { %1826 = vtanh.f32 %v584_v7 }
 0x10c   :  { %1828 = vtanh.f32 %v585_v4 }
 0x10d   :  { %1830 = vtanh.f32 %v586_v60  ;;  %v3141_v60 = vld [vmem:[#allocation10_spill] sm:$0xff] }
 0x116   :  { %v1825_v55 = vpop.eup %1824 }
 0x117   :  { %v591_v3 = vmul.f32 0.5, %v1825_v55  ;;  %v3152_v55 = vld [vmem:[#allocation21_spill] sm:$0xff] }
 0x118   :  { %v1827_v0 = vpop.eup %1826 }
 0x119   :  { %v595_v2 = vadd.f32 0.5, %v591_v3  ;;  %v592_v1 = vmul.f32 0.5, %v1827_v0  ;;  %v1829_v63 = vpop.eup %1828  ;;  %v3145_v3 = vld [vmem:[#allocation14_spill] sm:$0xff] }
 0x11a   :  { %v1831_v11 = vpop.eup %1830  ;;  %v3153_v0 = vld [vmem:[#allocation22_spill] sm:$0xff] }
 0x11b   :  { %v596_v8 = vadd.f32 0.5, %v592_v1  ;;  %v600_v62 = vmul.f32 %v1829_v63, %v595_v2  ;;  %v594_v12 = vmul.f32 0.5, %v1831_v11  ;;  %v3140_v1 = vld [vmem:[#allocation9_spill] sm:$0xff]  ;;  %v3143_v63 = vld [vmem:[#allocation12_spill] sm:$0xff] }
 0x11c   :  { %v3144_v2 = vld [vmem:[#allocation13_spill] sm:$0xff]  ;;  %v3155_v11 = vld [vmem:[#allocation24_spill] sm:$0xff] }
 0x11d   :  { %v599_v9 = vmul.f32 0.0, %v596_v8  ;;  %v598_v5 = vadd.f32 0.5, %v594_v12  ;;  %v3147_v8 = vld [vmem:[#allocation16_spill] sm:$0xff]  ;;  %v3156_v12 = vld [vmem:[#allocation25_spill] sm:$0xff] }
 0x11f   :  { %v2430_v28 = vadd.f32 %v600_v62, %v599_v9  ;;  %v3142_v62 = vld [vmem:[#allocation11_spill] sm:$0xff]  ;;  %v3148_v9 = vld [vmem:[#allocation17_spill] sm:$0xff] }
 0x121   :  { %1832 = vtanh.f32 %v2430_v28 }
 0x12e   :  { %v1833_v4 = vpop.eup %1832 }
 0x12f   :  { %v603_v7 = vmul.f32 %v1833_v4, %v598_v5  ;;  %v3157_v5 = vld [vmem:[#allocation26_spill] sm:$0xff]  ;;  %v3158_v4 = vmov 0.0  }
 0x131   :  { %673 = vmatmul.mubr.f32.vlgmr.msra.gmra.mxu0 %v603_v7  ;;  %744 = vmatmul.mubr.f32.vlgmr.msra.gmra.mxu1 %v603_v7  ;;  %v3159_v7 = vld [vmem:[#allocation27_spill] sm:$0xff] }
 0x132   :  { %776 = vmatpush1.msra.mxu0 %v2063_v13  ;;  %847 = vmatpush1.msra.mxu1 %v2065_v14 }
 0x133   :  { %777 = vmatprep.subr.mxu0 %v2069_v15  ;;  %848 = vmatprep.subr.mxu1 %v2071_v16 }
 0x134   :  { %778 = vmatpush1.msra.mxu0 %v2077_v17  ;;  %849 = vmatpush1.msra.mxu1 %v2079_v18 }
 0x135   :  { %779 = vmatprep.subr.mxu0 %v2088_v20  ;;  %850 = vmatprep.subr.mxu1 %v2090_v21 }
 0x136   :  { %780 = vmatpush1.msra.mxu0 %v2094_v22  ;;  %851 = vmatpush1.msra.mxu1 %v2096_v23 }
 0x137   :  { %781 = vmatprep.subr.mxu0 %v2100_v24  ;;  %852 = vmatprep.subr.mxu1 %v2102_v25 }
 0x138   :  { %782 = vmatpush1.msra.mxu0 %v2108_v26  ;;  %853 = vmatpush1.msra.mxu1 %v2110_v27 }
 0x139   :  { %783 = vmatprep.subr.mxu0 %v2119_v29  ;;  %854 = vmatprep.subr.mxu1 %v2121_v30 }
 0x13a   :  { %784 = vmatpush1.msra.mxu0 %v2125_v31  ;;  %855 = vmatpush1.msra.mxu1 %v2127_v32 }
 0x13b   :  { %785 = vmatprep.subr.mxu0 %v2131_v33  ;;  %856 = vmatprep.subr.mxu1 %v2133_v34 }
 0x13c   :  { %786 = vmatpush1.msra.mxu0 %v2139_v35  ;;  %857 = vmatpush1.msra.mxu1 %v2141_v36 }
 0x13d   :  { %787 = vmatprep.subr.mxu0 %v2150_v38  ;;  %858 = vmatprep.subr.mxu1 %v2152_v39 }
 0x13e   :  { %788 = vmatpush1.msra.mxu0 %v2156_v40  ;;  %859 = vmatpush1.msra.mxu1 %v2158_v41 }
 0x13f   :  { %789 = vmatprep.subr.mxu0 %v2162_v42  ;;  %860 = vmatprep.subr.mxu1 %v2164_v43 }
 0x140   :  { %790 = vmatpush1.msra.mxu0 %v2170_v44  ;;  %861 = vmatpush1.msra.mxu1 %v2172_v45 }
 0x141   :  { %791 = vmatprep.subr.mxu0 %v2181_v47  ;;  %862 = vmatprep.subr.mxu1 %v2183_v48 }
 0x142   :  { %792 = vmatpush1.msra.mxu0 %v2187_v49  ;;  %863 = vmatpush1.msra.mxu1 %v2189_v50 }
 0x143   :  { %793 = vmatprep.subr.mxu0 %v2193_v51  ;;  %864 = vmatprep.subr.mxu1 %v2195_v52 }
 0x144   :  { %794 = vmatpush1.msra.mxu0 %v2201_v53  ;;  %865 = vmatpush1.msra.mxu1 %v2203_v54 }
 0x145   :  { %795 = vmatprep.subr.mxu0 %v2212_v56  ;;  %866 = vmatprep.subr.mxu1 %v2214_v57 }
 0x146   :  { %796 = vmatpush1.msra.mxu0 %v2218_v58  ;;  %867 = vmatpush1.msra.mxu1 %v2220_v59 }
 0x147   :  { %797 = vmatprep.subr.mxu0 %v3140_v1  ;;  %868 = vmatprep.subr.mxu1 %v2226_v61 }
 0x148   :  { %798 = vmatpush1.msra.mxu0 %v3141_v60  ;;  %869 = vmatpush1.msra.mxu1 %v3142_v62 }
 0x149   :  { %799 = vmatprep.subr.mxu0 %v3143_v63  ;;  %870 = vmatprep.subr.mxu1 %v3144_v2 }
 0x14a   :  { %800 = vmatpush1.msra.mxu0 %v3145_v3  ;;  %871 = vmatpush1.msra.mxu1 %v3146_v6 }
 0x14b   :  { %801 = vmatprep.subr.mxu0 %v3147_v8  ;;  %872 = vmatprep.subr.mxu1 %v3148_v9  ;;  %v3164_v8 = vld [vmem:[#allocation29_spill] sm:$0xff] }
 0x14c   :  { %802 = vmatpush1.msra.mxu0 %v3149_v19  ;;  %873 = vmatpush1.msra.mxu1 %v3150_v37  ;;  %v3160_v37 = vld [vmem:[#allocation7_spill] sm:$0xff] }
 0x14d   :  { %803 = vmatprep.subr.mxu0 %v3151_v46  ;;  %874 = vmatprep.subr.mxu1 %v3152_v55  ;;  %v3161_v46 = vld [vmem:[#allocation8_spill] sm:$0xff] }
 0x14e   :  { %804 = vmatpush1.msra.mxu0 %v3153_v0  ;;  %875 = vmatpush1.msra.mxu1 %v3154_v10  ;;  %v3162_v0 = vld [vmem:[#allocation28_spill] sm:$0xff] }
 0x14f   :  { %805 = vmatprep.subr.mxu0 %v3155_v11  ;;  %876 = vmatprep.subr.mxu1 %v3156_v12  ;;  %v3163_v11 = vld [vmem:[#allocation30_spill] sm:$0xff] }
 0x150   :  { %806 = vmatpush1.msra.mxu0 %v3157_v5  ;;  %839 = vmatprep.mubr.f32.mxu0 %v3158_v4 }
 0x151   :  { %877 = vmatpush1.msra.mxu1 %v3159_v7  ;;  %910 = vmatprep.mubr.f32.mxu1 %v3158_v4  ;;  %v3165_v7 = vld [vmem:[#allocation31_spill] sm:$0xff] }
 0x152   :  { %942 = vmatprep.subr.mxu0 %v3160_v37  ;;  %1013 = vmatprep.subr.mxu1 %v3161_v46 }
 0x1f1   :  { %v674_v55 = vpop.f32.mrf.mxu0  ;;  %v745_v10 = vpop.f32.mrf.mxu1 }
 0x1f2   :  { %v750_v19 = vadd.f32 %v674_v55, %v3162_v0  ;;  %v752_v5 = vadd.f32 %v745_v10, %v3164_v8 }
 0x1f3   :  { %v676_v9 = vpop.f32.mrf.mxu0  ;;  %v747_v6 = vpop.f32.mrf.mxu1 }
 0x1f4   :  { %1834 = vtanh.f32 %v750_v19  ;;  %v751_v12 = vadd.f32 %v676_v9, %v3163_v11  ;;  %v753_v3 = vadd.f32 %v747_v6, %v3165_v7  ;;  %v3176_v7 = vld [vmem:[#allocation20_spill] sm:$0xff] }
 0x1f6   :  { %1836 = vtanh.f32 %v751_v12  ;;  %v3173_v12 = vld [vmem:[#allocation17_spill] sm:$0xff] }
 0x1f7   :  { %1838 = vtanh.f32 %v752_v5  ;;  %v3174_v5 = vld [vmem:[#allocation18_spill] sm:$0xff] }
 0x1f8   :  { %1840 = vtanh.f32 %v753_v3  ;;  %v3170_v3 = vld [vmem:[#allocation14_spill] sm:$0xff] }
 0x201   :  { %v1835_v4 = vpop.eup %1834 }
 0x202   :  { %v758_v2 = vmul.f32 0.5, %v1835_v4  ;;  %v3175_v4 = vld [vmem:[#allocation19_spill] sm:$0xff] }
 0x203   :  { %v1837_v37 = vpop.eup %1836 }
 0x204   :  { %v762_v63 = vadd.f32 0.5, %v758_v2  ;;  %v759_v46 = vmul.f32 0.5, %v1837_v37  ;;  %v1839_v55 = vpop.eup %1838  ;;  %v3169_v2 = vld [vmem:[#allocation13_spill] sm:$0xff]  ;;  %v3171_v37 = vld [vmem:[#allocation15_spill] sm:$0xff] }
 0x205   :  { %v1841_v8 = vpop.eup %1840 }
 0x206   :  { %v763_v62 = vadd.f32 0.5, %v759_v46  ;;  %v767_v19 = vmul.f32 %v1839_v55, %v762_v63  ;;  %v761_v9 = vmul.f32 0.5, %v1841_v8  ;;  %v3168_v63 = vld [vmem:[#allocation12_spill] sm:$0xff]  ;;  %v3177_v55 = vld [vmem:[#allocation21_spill] sm:$0xff] }
 0x207   :  { %v3172_v46 = vld [vmem:[#allocation16_spill] sm:$0xff] }
 0x208   :  { %v766_v0 = vmul.f32 %v763_v62, %v2430_v28  ;;  %v765_v10 = vadd.f32 0.5, %v761_v9  ;;  %v3166_v28 = vld [vmem:[#allocation10_spill] sm:$0xff]  ;;  %v3167_v62 = vld [vmem:[#allocation11_spill] sm:$0xff]  ;;  %v3180_v8 = vld [vmem:[#allocation24_spill] sm:$0xff] }
 0x209   :  { %v3181_v9 = vld [vmem:[#allocation25_spill] sm:$0xff] }
 0x20a   :  { %v2504_v60 = vadd.f32 %v767_v19, %v766_v0  ;;  %v3178_v0 = vld [vmem:[#allocation22_spill] sm:$0xff]  ;;  %v3179_v19 = vld [vmem:[#allocation23_spill] sm:$0xff] }
 0x20c   :  { %1842 = vtanh.f32 %v2504_v60 }
 0x219   :  { %v1843_v11 = vpop.eup %1842 }
 0x21a   :  { %v770_v6 = vmul.f32 %v1843_v11, %v765_v10  ;;  %v3182_v10 = vld [vmem:[#allocation26_spill] sm:$0xff]  ;;  %v3183_v11 = vmov 0.0  }
 0x21c   :  { %840 = vmatmul.mubr.f32.vlgmr.msra.gmra.mxu0 %v770_v6  ;;  %911 = vmatmul.mubr.f32.vlgmr.msra.gmra.mxu1 %v770_v6  ;;  %v3184_v6 = vld [vmem:[#allocation27_spill] sm:$0xff] }
 0x21d   :  { %943 = vmatpush1.msra.mxu0 %v2063_v13  ;;  %1014 = vmatpush1.msra.mxu1 %v2065_v14 }
 0x21e   :  { %944 = vmatprep.subr.mxu0 %v2069_v15  ;;  %1015 = vmatprep.subr.mxu1 %v2071_v16 }
 0x21f   :  { %945 = vmatpush1.msra.mxu0 %v2077_v17  ;;  %1016 = vmatpush1.msra.mxu1 %v2079_v18 }
 0x220   :  { %946 = vmatprep.subr.mxu0 %v2088_v20  ;;  %1017 = vmatprep.subr.mxu1 %v2090_v21 }
 0x221   :  { %947 = vmatpush1.msra.mxu0 %v2094_v22  ;;  %1018 = vmatpush1.msra.mxu1 %v2096_v23 }
 0x222   :  { %948 = vmatprep.subr.mxu0 %v2100_v24  ;;  %1019 = vmatprep.subr.mxu1 %v2102_v25 }
 0x223   :  { %949 = vmatpush1.msra.mxu0 %v2108_v26  ;;  %1020 = vmatpush1.msra.mxu1 %v2110_v27 }
 0x224   :  { %950 = vmatprep.subr.mxu0 %v2119_v29  ;;  %1021 = vmatprep.subr.mxu1 %v2121_v30 }
 0x225   :  { %951 = vmatpush1.msra.mxu0 %v2125_v31  ;;  %1022 = vmatpush1.msra.mxu1 %v2127_v32 }
 0x226   :  { %952 = vmatprep.subr.mxu0 %v2131_v33  ;;  %1023 = vmatprep.subr.mxu1 %v2133_v34 }
 0x227   :  { %953 = vmatpush1.msra.mxu0 %v2139_v35  ;;  %1024 = vmatpush1.msra.mxu1 %v2141_v36 }
 0x228   :  { %954 = vmatprep.subr.mxu0 %v2150_v38  ;;  %1025 = vmatprep.subr.mxu1 %v2152_v39 }
 0x229   :  { %955 = vmatpush1.msra.mxu0 %v2156_v40  ;;  %1026 = vmatpush1.msra.mxu1 %v2158_v41 }
 0x22a   :  { %956 = vmatprep.subr.mxu0 %v2162_v42  ;;  %1027 = vmatprep.subr.mxu1 %v2164_v43 }
 0x22b   :  { %957 = vmatpush1.msra.mxu0 %v2170_v44  ;;  %1028 = vmatpush1.msra.mxu1 %v2172_v45 }
 0x22c   :  { %958 = vmatprep.subr.mxu0 %v2181_v47  ;;  %1029 = vmatprep.subr.mxu1 %v2183_v48 }
 0x22d   :  { %959 = vmatpush1.msra.mxu0 %v2187_v49  ;;  %1030 = vmatpush1.msra.mxu1 %v2189_v50 }
 0x22e   :  { %960 = vmatprep.subr.mxu0 %v2193_v51  ;;  %1031 = vmatprep.subr.mxu1 %v2195_v52 }
 0x22f   :  { %961 = vmatpush1.msra.mxu0 %v2201_v53  ;;  %1032 = vmatpush1.msra.mxu1 %v2203_v54 }
 0x230   :  { %962 = vmatprep.subr.mxu0 %v2212_v56  ;;  %1033 = vmatprep.subr.mxu1 %v2214_v57 }
 0x231   :  { %963 = vmatpush1.msra.mxu0 %v2218_v58  ;;  %1034 = vmatpush1.msra.mxu1 %v2220_v59 }
 0x232   :  { %964 = vmatprep.subr.mxu0 %v3140_v1  ;;  %1035 = vmatprep.subr.mxu1 %v2226_v61 }
 0x233   :  { %965 = vmatpush1.msra.mxu0 %v3166_v28  ;;  %1036 = vmatpush1.msra.mxu1 %v3167_v62 }
 0x234   :  { %966 = vmatprep.subr.mxu0 %v3168_v63  ;;  %1037 = vmatprep.subr.mxu1 %v3169_v2 }
 0x235   :  { %967 = vmatpush1.msra.mxu0 %v3170_v3  ;;  %1038 = vmatpush1.msra.mxu1 %v3171_v37 }
 0x236   :  { %968 = vmatprep.subr.mxu0 %v3172_v46  ;;  %1039 = vmatprep.subr.mxu1 %v3173_v12  ;;  %v3189_v46 = vld [vmem:[#allocation33_spill] sm:$0xff] }
 0x237   :  { %969 = vmatpush1.msra.mxu0 %v3174_v5  ;;  %1040 = vmatpush1.msra.mxu1 %v3175_v4  ;;  %v3185_v4 = vld [vmem:[#allocation7_spill] sm:$0xff] }
 0x238   :  { %970 = vmatprep.subr.mxu0 %v3176_v7  ;;  %1041 = vmatprep.subr.mxu1 %v3177_v55  ;;  %v3186_v7 = vld [vmem:[#allocation8_spill] sm:$0xff] }
 0x239   :  { %971 = vmatpush1.msra.mxu0 %v3178_v0  ;;  %1042 = vmatpush1.msra.mxu1 %v3179_v19  ;;  %v3187_v0 = vld [vmem:[#allocation32_spill] sm:$0xff] }
 0x23a   :  { %972 = vmatprep.subr.mxu0 %v3180_v8  ;;  %1043 = vmatprep.subr.mxu1 %v3181_v9  ;;  %v3188_v8 = vld [vmem:[#allocation34_spill] sm:$0xff] }
 0x23b   :  { %973 = vmatpush1.msra.mxu0 %v3182_v10  ;;  %1006 = vmatprep.mubr.f32.mxu0 %v3183_v11 }
 0x23c   :  { %1044 = vmatpush1.msra.mxu1 %v3184_v6  ;;  %1077 = vmatprep.mubr.f32.mxu1 %v3183_v11  ;;  %v3190_v6 = vld [vmem:[#allocation35_spill] sm:$0xff] }
 0x23d   :  { %1109 = vmatprep.subr.mxu0 %v3185_v4  ;;  %1180 = vmatprep.subr.mxu1 %v3186_v7 }
 0x2dc   :  { %v841_v55 = vpop.f32.mrf.mxu0  ;;  %v912_v19 = vpop.f32.mrf.mxu1 }
 0x2dd   :  { %v917_v5 = vadd.f32 %v841_v55, %v3187_v0  ;;  %v919_v10 = vadd.f32 %v912_v19, %v3189_v46 }
 0x2de   :  { %v843_v12 = vpop.f32.mrf.mxu0  ;;  %v914_v37 = vpop.f32.mrf.mxu1 }
 0x2df   :  { %1844 = vtanh.f32 %v917_v5  ;;  %v918_v9 = vadd.f32 %v843_v12, %v3188_v8  ;;  %v920_v3 = vadd.f32 %v914_v37, %v3190_v6  ;;  %v2674_v6 = vld [vmem:[#allocation4 + $0x1d0] sm:$0xff] }
 0x2e1   :  { %1846 = vtanh.f32 %v918_v9  ;;  %v2662_v9 = vld [vmem:[#allocation4 + $0x1f0] sm:$0xff] }
 0x2e2   :  { %1848 = vtanh.f32 %v919_v10  ;;  %v2668_v10 = vld [vmem:[#allocation4 + $0x1d8] sm:$0xff] }
 0x2e3   :  { %1850 = vtanh.f32 %v920_v3  ;;  %v2659_v3 = vld [vmem:[#allocation4 + $0x1e0] sm:$0xff] }
 0x2ec   :  { %v1845_v11 = vpop.eup %1844 }
 0x2ed   :  { %v925_v2 = vmul.f32 0.5, %v1845_v11  ;;  %v2671_v11 = vld [vmem:[#allocation4 + $0x1c0] sm:$0xff] }
 0x2ee   :  { %v1847_v4 = vpop.eup %1846 }
 0x2ef   :  { %v929_v63 = vadd.f32 0.5, %v925_v2  ;;  %v926_v7 = vmul.f32 0.5, %v1847_v4  ;;  %v1849_v55 = vpop.eup %1848  ;;  %v2677_v4 = vld [vmem:[#allocation4 + $0x1a8] sm:$0xff] }
 0x2f0   :  { %v1851_v46 = vpop.eup %1850 }
 0x2f1   :  { %v930_v62 = vadd.f32 0.5, %v926_v7  ;;  %v934_v5 = vmul.f32 %v1849_v55, %v929_v63  ;;  %v928_v12 = vmul.f32 0.5, %v1851_v46  ;;  %v2680_v7 = vld [vmem:[#allocation4 + $0x1b8] sm:$0xff]  ;;  %v2683_v55 = vld [vmem:[#allocation4 + $0x1a0] sm:$0xff] }
 0x2f2   :  { %v2692_v46 = vld [vmem:[#allocation4 + $0x198] sm:$0xff] }
 0x2f3   :  { %v933_v0 = vmul.f32 %v930_v62, %v2504_v60  ;;  %v932_v19 = vadd.f32 0.5, %v928_v12  ;;  %v2695_v12 = vld [vmem:[#allocation4 + $0x180] sm:$0xff] }
 0x2f5   :  { %v2578_v28 = vadd.f32 %v934_v5, %v933_v0  ;;  %v2686_v0 = vld [vmem:[#allocation4 + $0x1b0] sm:$0xff]  ;;  %v2689_v5 = vld [vmem:[#allocation4 + $0x188] sm:$0xff] }
 0x2f7   :  { %1852 = vtanh.f32 %v2578_v28 }
 0x304   :  { %v1853_v8 = vpop.eup %1852 }
 0x305   :  { %v937_v37 = vmul.f32 %v1853_v8, %v932_v19  ;;  %v2698_v19 = vld [vmem:[#allocation4 + $0x190] sm:$0xff]  ;;  %v2701_v8 = vld [vmem:[#allocation4 + $0x168] sm:$0xff] }
 0x307   :  { %1007 = vmatmul.mubr.f32.vlgmr.msra.gmra.mxu0 %v937_v37  ;;  %1078 = vmatmul.mubr.f32.vlgmr.msra.gmra.mxu1 %v937_v37  ;;  %v2704_v37 = vld [vmem:[#allocation4 + $0x178] sm:$0xff] }
 0x308   :  { %1110 = vmatpush1.msra.mxu0 %v2063_v13  ;;  %1181 = vmatpush1.msra.mxu1 %v2065_v14  ;;  %v3191_v13 = vld [vmem:[#allocation10_spill] sm:$0xff]  ;;  %v3192_v14 = vld [vmem:[#allocation11_spill] sm:$0xff] }
 0x309   :  { %1111 = vmatprep.subr.mxu0 %v2069_v15  ;;  %1182 = vmatprep.subr.mxu1 %v2071_v16  ;;  %v3193_v15 = vld [vmem:[#allocation12_spill] sm:$0xff]  ;;  %v3194_v16 = vld [vmem:[#allocation13_spill] sm:$0xff] }
 0x30a   :  { %1112 = vmatpush1.msra.mxu0 %v2077_v17  ;;  %1183 = vmatpush1.msra.mxu1 %v2079_v18  ;;  %v3195_v17 = vld [vmem:[#allocation14_spill] sm:$0xff]  ;;  %v3196_v18 = vld [vmem:[#allocation15_spill] sm:$0xff] }
 0x30b   :  { %1113 = vmatprep.subr.mxu0 %v2088_v20  ;;  %1184 = vmatprep.subr.mxu1 %v2090_v21  ;;  %v3197_v20 = vld [vmem:[#allocation16_spill] sm:$0xff]  ;;  %v3198_v21 = vld [vmem:[#allocation17_spill] sm:$0xff] }
 0x30c   :  { %1114 = vmatpush1.msra.mxu0 %v2094_v22  ;;  %1185 = vmatpush1.msra.mxu1 %v2096_v23  ;;  %v3199_v22 = vld [vmem:[#allocation18_spill] sm:$0xff]  ;;  %v3200_v23 = vld [vmem:[#allocation19_spill] sm:$0xff] }
 0x30d   :  { %1115 = vmatprep.subr.mxu0 %v2100_v24  ;;  %1186 = vmatprep.subr.mxu1 %v2102_v25  ;;  %v3201_v24 = vld [vmem:[#allocation20_spill] sm:$0xff]  ;;  %v3202_v25 = vld [vmem:[#allocation21_spill] sm:$0xff] }
 0x30e   :  { %1116 = vmatpush1.msra.mxu0 %v2108_v26  ;;  %1187 = vmatpush1.msra.mxu1 %v2110_v27  ;;  %v3203_v26 = vld [vmem:[#allocation22_spill] sm:$0xff]  ;;  %v3204_v27 = vld [vmem:[#allocation23_spill] sm:$0xff] }
 0x30f   :  { %1117 = vmatprep.subr.mxu0 %v2119_v29  ;;  %1188 = vmatprep.subr.mxu1 %v2121_v30  ;;  %v3205_v29 = vld [vmem:[#allocation24_spill] sm:$0xff]  ;;  %v3206_v30 = vld [vmem:[#allocation25_spill] sm:$0xff] }
 0x310   :  { %1118 = vmatpush1.msra.mxu0 %v2125_v31  ;;  %1189 = vmatpush1.msra.mxu1 %v2127_v32  ;;  %v3207_v31 = vld [vmem:[#allocation26_spill] sm:$0xff]  ;;  %v3208_v32 = vmov 0.0  }
 0x311   :  { %1119 = vmatprep.subr.mxu0 %v2131_v33  ;;  %1190 = vmatprep.subr.mxu1 %v2133_v34  ;;  %v3209_v33 = vld [vmem:[#allocation27_spill] sm:$0xff]  ;;  %v2645_v34 = vld [vmem:[#allocation4 + $0x1e8] sm:$0xff] }
 0x312   :  { %1120 = vmatpush1.msra.mxu0 %v2139_v35  ;;  %1191 = vmatpush1.msra.mxu1 %v2141_v36  ;;  %3210 = vst [vmem:[#allocation9_spill] sm:$0xff] %v2645_v34  ;;  %v2648_v35 = vld [vmem:[#allocation4 + $0x1f8] sm:$0xff] }
 0x313   :  { %1121 = vmatprep.subr.mxu0 %v2150_v38  ;;  %1192 = vmatprep.subr.mxu1 %v2152_v39  ;;  %3211 = vst [vmem:[#allocation28_spill] sm:$0xff] %v2648_v35  ;;  %v3212_v38 = vld [vmem:[#allocation36_spill] sm:$0xff] }
 0x314   :  { %1122 = vmatpush1.msra.mxu0 %v2156_v40  ;;  %1193 = vmatpush1.msra.mxu1 %v2158_v41 }
 0x315   :  { %1123 = vmatprep.subr.mxu0 %v2162_v42  ;;  %1194 = vmatprep.subr.mxu1 %v2164_v43  ;;  %v3213_v42 = vld [vmem:[#allocation38_spill] sm:$0xff] }
 0x316   :  { %1124 = vmatpush1.msra.mxu0 %v2170_v44  ;;  %1195 = vmatpush1.msra.mxu1 %v2172_v45  ;;  %v3214_v44 = vld [vmem:[#allocation37_spill] sm:$0xff] }
 0x317   :  { %1125 = vmatprep.subr.mxu0 %v2181_v47  ;;  %1196 = vmatprep.subr.mxu1 %v2183_v48  ;;  %v3215_v48 = vld [vmem:[#allocation39_spill] sm:$0xff] }
 0x318   :  { %1126 = vmatpush1.msra.mxu0 %v2187_v49  ;;  %1197 = vmatpush1.msra.mxu1 %v2189_v50 }
 0x319   :  { %1127 = vmatprep.subr.mxu0 %v2193_v51  ;;  %1198 = vmatprep.subr.mxu1 %v2195_v52 }
 0x31a   :  { %1128 = vmatpush1.msra.mxu0 %v2201_v53  ;;  %1199 = vmatpush1.msra.mxu1 %v2203_v54 }
 0x31b   :  { %1129 = vmatprep.subr.mxu0 %v2212_v56  ;;  %1200 = vmatprep.subr.mxu1 %v2214_v57 }
 0x31c   :  { %1130 = vmatpush1.msra.mxu0 %v2218_v58  ;;  %1201 = vmatpush1.msra.mxu1 %v2220_v59 }
 0x31d   :  { %1131 = vmatprep.subr.mxu0 %v3140_v1  ;;  %1202 = vmatprep.subr.mxu1 %v2226_v61 }
 0x31e   :  { %1132 = vmatpush1.msra.mxu0 %v3191_v13  ;;  %1203 = vmatpush1.msra.mxu1 %v3192_v14  ;;  %v2707_v13 = vld [vmem:[#allocation4 + $0x160] sm:$0xff]  ;;  %v2710_v14 = vld [vmem:[#allocation4 + $0x170] sm:$0xff] }
 0x31f   :  { %1133 = vmatprep.subr.mxu0 %v3193_v15  ;;  %1204 = vmatprep.subr.mxu1 %v3194_v16 }
 0x320   :  { %1134 = vmatpush1.msra.mxu0 %v3195_v17  ;;  %1205 = vmatpush1.msra.mxu1 %v3196_v18 }
 0x321   :  { %1135 = vmatprep.subr.mxu0 %v3197_v20  ;;  %1206 = vmatprep.subr.mxu1 %v3198_v21 }
 0x322   :  { %1136 = vmatpush1.msra.mxu0 %v3199_v22  ;;  %1207 = vmatpush1.msra.mxu1 %v3200_v23 }
 0x323   :  { %1137 = vmatprep.subr.mxu0 %v3201_v24  ;;  %1208 = vmatprep.subr.mxu1 %v3202_v25 }
 0x324   :  { %1138 = vmatpush1.msra.mxu0 %v3203_v26  ;;  %1209 = vmatpush1.msra.mxu1 %v3204_v27 }
 0x325   :  { %1139 = vmatprep.subr.mxu0 %v3205_v29  ;;  %1210 = vmatprep.subr.mxu1 %v3206_v30 }
 0x326   :  { %1140 = vmatpush1.msra.mxu0 %v3207_v31  ;;  %1173 = vmatprep.mubr.f32.mxu0 %v3208_v32 }
 0x327   :  { %1211 = vmatpush1.msra.mxu1 %v3209_v33  ;;  %1244 = vmatprep.mubr.f32.mxu1 %v3208_v32 }
 0x328   :  { %1276 = vmatprep.subr.mxu0 %v2645_v34  ;;  %1347 = vmatprep.subr.mxu1 %v2648_v35 }
 0x3c7   :  { %v1008_v36 = vpop.f32.mrf.mxu0  ;;  %v1079_v40 = vpop.f32.mrf.mxu1 }
 0x3c8   :  { %v1084_v39 = vadd.f32 %v1008_v36, %v3212_v38  ;;  %v1086_v45 = vadd.f32 %v1079_v40, %v3214_v44  ;;  %v2713_v36 = vld [vmem:[#allocation4 + $0x148] sm:$0xff]  ;;  %v2716_v38 = vld [vmem:[#allocation4 + $0x158] sm:$0xff]  ;;  %v2722_v40 = vld [vmem:[#allocation4 + $0x150] sm:$0xff] }
 0x3c9   :  { %v1010_v41 = vpop.f32.mrf.mxu0  ;;  %v1081_v47 = vpop.f32.mrf.mxu1  ;;  %v2734_v44 = vld [vmem:[#allocation4 + $0x130] sm:$0xff] }
 0x3ca   :  { %1854 = vtanh.f32 %v1084_v39  ;;  %v1085_v43 = vadd.f32 %v1010_v41, %v3213_v42  ;;  %v1087_v49 = vadd.f32 %v1081_v47, %v3215_v48  ;;  %v2719_v39 = vld [vmem:[#allocation4 + $0x140] sm:$0xff]  ;;  %v2725_v41 = vld [vmem:[#allocation4 + $0x128] sm:$0xff]  ;;  %v2728_v42 = vld [vmem:[#allocation4 + $0x138] sm:$0xff] }
 0x3cb   :  { %v2740_v47 = vld [vmem:[#allocation4 + $0x118] sm:$0xff]  ;;  %v2743_v48 = vld [vmem:[#allocation4 + $0x100] sm:$0xff] }
 0x3cc   :  { %1856 = vtanh.f32 %v1085_v43  ;;  %v2731_v43 = vld [vmem:[#allocation4 + $0x120] sm:$0xff] }
 0x3cd   :  { %1858 = vtanh.f32 %v1086_v45  ;;  %v2737_v45 = vld [vmem:[#allocation4 + $0x108] sm:$0xff] }
 0x3ce   :  { %1860 = vtanh.f32 %v1087_v49  ;;  %v2746_v49 = vld [vmem:[#allocation4 + $0x110] sm:$0xff] }
 0x3d7   :  { %v1855_v50 = vpop.eup %1854 }
 0x3d8   :  { %v1092_v51 = vmul.f32 0.5, %v1855_v50  ;;  %v2749_v50 = vld [vmem:[#allocation4 + $0xe8] sm:$0xff] }
 0x3d9   :  { %v1857_v52 = vpop.eup %1856 }
 0x3da   :  { %v1096_v53 = vadd.f32 0.5, %v1092_v51  ;;  %v1093_v54 = vmul.f32 0.5, %v1857_v52  ;;  %v1859_v57 = vpop.eup %1858  ;;  %v2752_v51 = vld [vmem:[#allocation4 + $0xf8] sm:$0xff]  ;;  %v2755_v52 = vld [vmem:[#allocation4 + $0xe0] sm:$0xff] }
 0x3db   :  { %v1861_v1 = vpop.eup %1860 }
 0x3dc   :  { %v1097_v56 = vadd.f32 0.5, %v1093_v54  ;;  %v1101_v59 = vmul.f32 %v1859_v57, %v1096_v53  ;;  %v1095_v60 = vmul.f32 0.5, %v1861_v1  ;;  %v2758_v53 = vld [vmem:[#allocation4 + $0xf0] sm:$0xff]  ;;  %v2761_v54 = vld [vmem:[#allocation4 + $0xc8] sm:$0xff]  ;;  %v2767_v57 = vld [vmem:[#allocation4 + $0xc0] sm:$0xff] }
 0x3dd   :  { %v2776_v1 = vld [vmem:[#allocation4 + $0xb8] sm:$0xff] }
 0x3de   :  { %v1100_v58 = vmul.f32 %v1097_v56, %v2578_v28  ;;  %v1099_v62 = vadd.f32 0.5, %v1095_v60  ;;  %v2665_v28 = vld [vmem:[#allocation4 + $0x1c8] sm:$0xff]  ;;  %v2764_v56 = vld [vmem:[#allocation4 + $0xd8] sm:$0xff]  ;;  %3217 = vst [vmem:[#allocation29_spill] sm:$0xff] %v2776_v1  ;;  %v2779_v60 = vld [vmem:[#allocation4 + $0xa0] sm:$0xff] }
 0x3e0   :  { %v2656_v61 = vadd.f32 %v1101_v59, %v1100_v58  ;;  %v2770_v58 = vld [vmem:[#allocation4 + $0xd0] sm:$0xff]  ;;  %v2773_v59 = vld [vmem:[#allocation4 + $0xa8] sm:$0xff] }
 0x3e1   :  { %3216 = vst [vmem:[#allocation30_spill] sm:$0xff] %v2773_v59 }
 0x3e2   :  { %1862 = vtanh.f32 %v2656_v61 }
 0x3ef   :  { %v1863_v63 = vpop.eup %1862 }
 0x3f0   :  { %v1104_v2 = vmul.f32 %v1863_v63, %v1099_v62  ;;  %v2782_v62 = vld [vmem:[#allocation4 + $0xb0] sm:$0xff]  ;;  %v2785_v63 = vld [vmem:[#allocation4 + $0x88] sm:$0xff] }
 0x3f2   :  { %1174 = vmatmul.mubr.f32.vlgmr.msra.gmra.mxu0 %v1104_v2  ;;  %1245 = vmatmul.mubr.f32.vlgmr.msra.gmra.mxu1 %v1104_v2  ;;  %v2788_v2 = vld [vmem:[#allocation4 + $0x98] sm:$0xff] }
 0x3f3   :  { %1277 = vmatpush1.msra.mxu0 %v2659_v3  ;;  %1348 = vmatpush1.msra.mxu1 %v2662_v9 }
 0x3f4   :  { %1278 = vmatprep.subr.mxu0 %v2665_v28  ;;  %1349 = vmatprep.subr.mxu1 %v2668_v10 }
 0x3f5   :  { %1279 = vmatpush1.msra.mxu0 %v2671_v11  ;;  %1350 = vmatpush1.msra.mxu1 %v2674_v6 }
 0x3f6   :  { %1280 = vmatprep.subr.mxu0 %v2677_v4  ;;  %1351 = vmatprep.subr.mxu1 %v2680_v7 }
 0x3f7   :  { %1281 = vmatpush1.msra.mxu0 %v2683_v55  ;;  %1352 = vmatpush1.msra.mxu1 %v2686_v0 }
 0x3f8   :  { %1282 = vmatprep.subr.mxu0 %v2689_v5  ;;  %1353 = vmatprep.subr.mxu1 %v2692_v46 }
 0x3f9   :  { %1283 = vmatpush1.msra.mxu0 %v2695_v12  ;;  %1354 = vmatpush1.msra.mxu1 %v2698_v19 }
 0x3fa   :  { %1284 = vmatprep.subr.mxu0 %v2701_v8  ;;  %1355 = vmatprep.subr.mxu1 %v2704_v37 }
 0x3fb   :  { %1285 = vmatpush1.msra.mxu0 %v2707_v13  ;;  %1356 = vmatpush1.msra.mxu1 %v2710_v14 }
 0x3fc   :  { %1286 = vmatprep.subr.mxu0 %v2713_v36  ;;  %1357 = vmatprep.subr.mxu1 %v2716_v38 }
 0x3fd   :  { %1287 = vmatpush1.msra.mxu0 %v2719_v39  ;;  %1358 = vmatpush1.msra.mxu1 %v2722_v40 }
 0x3fe   :  { %1288 = vmatprep.subr.mxu0 %v2725_v41  ;;  %1359 = vmatprep.subr.mxu1 %v2728_v42 }
 0x3ff   :  { %1289 = vmatpush1.msra.mxu0 %v2731_v43  ;;  %1360 = vmatpush1.msra.mxu1 %v2734_v44 }
 0x400   :  { %1290 = vmatprep.subr.mxu0 %v2737_v45  ;;  %1361 = vmatprep.subr.mxu1 %v2740_v47 }
 0x401   :  { %1291 = vmatpush1.msra.mxu0 %v2743_v48  ;;  %1362 = vmatpush1.msra.mxu1 %v2746_v49 }
 0x402   :  { %1292 = vmatprep.subr.mxu0 %v2749_v50  ;;  %1363 = vmatprep.subr.mxu1 %v2752_v51 }
 0x403   :  { %1293 = vmatpush1.msra.mxu0 %v2755_v52  ;;  %1364 = vmatpush1.msra.mxu1 %v2758_v53 }
 0x404   :  { %1294 = vmatprep.subr.mxu0 %v2761_v54  ;;  %1365 = vmatprep.subr.mxu1 %v2764_v56 }
 0x405   :  { %1295 = vmatpush1.msra.mxu0 %v2767_v57  ;;  %1366 = vmatpush1.msra.mxu1 %v2770_v58 }
 0x406   :  { %1296 = vmatprep.subr.mxu0 %v2773_v59  ;;  %1367 = vmatprep.subr.mxu1 %v2776_v1  ;;  %v2791_v59 = vld [vmem:[#allocation4 + $0x80] sm:$0xff]  ;;  %v2794_v1 = vld [vmem:[#allocation4 + $0x90] sm:$0xff] }
 0x407   :  { %1297 = vmatpush1.msra.mxu0 %v2779_v60  ;;  %1368 = vmatpush1.msra.mxu1 %v2782_v62  ;;  %3218 = vst [vmem:[#allocation31_spill] sm:$0xff] %v2791_v59  ;;  %3219 = vst [vmem:[#allocation7_spill] sm:$0xff] %v2794_v1 }
 0x408   :  { %1298 = vmatprep.subr.mxu0 %v2785_v63  ;;  %1369 = vmatprep.subr.mxu1 %v2788_v2 }
 0x409   :  { %1299 = vmatpush1.msra.mxu0 %v2791_v59  ;;  %1370 = vmatpush1.msra.mxu1 %v2794_v1 }
 0x40a   :  { %1300 = vmatprep.subr.mxu0 %v3193_v15  ;;  %1371 = vmatprep.subr.mxu1 %v3194_v16  ;;  %v3220_v16 = vld [vmem:[#allocation40_spill] sm:$0xff] }
 0x40b   :  { %1301 = vmatpush1.msra.mxu0 %v3195_v17  ;;  %1372 = vmatpush1.msra.mxu1 %v3196_v18 }
 0x40c   :  { %1302 = vmatprep.subr.mxu0 %v3197_v20  ;;  %1373 = vmatprep.subr.mxu1 %v3198_v21  ;;  %v3221_v21 = vld [vmem:[#allocation42_spill] sm:$0xff] }
 0x40d   :  { %1303 = vmatpush1.msra.mxu0 %v3199_v22  ;;  %1374 = vmatpush1.msra.mxu1 %v3200_v23  ;;  %v3222_v23 = vld [vmem:[#allocation41_spill] sm:$0xff] }
 0x40e   :  { %1304 = vmatprep.subr.mxu0 %v3201_v24  ;;  %1375 = vmatprep.subr.mxu1 %v3202_v25 }
 0x40f   :  { %1305 = vmatpush1.msra.mxu0 %v3203_v26  ;;  %1376 = vmatpush1.msra.mxu1 %v3204_v27  ;;  %v3223_v26 = vld [vmem:[#allocation43_spill] sm:$0xff] }
 0x410   :  { %1306 = vmatprep.subr.mxu0 %v3205_v29  ;;  %1377 = vmatprep.subr.mxu1 %v3206_v30 }
 0x411   :  { %1307 = vmatpush1.msra.mxu0 %v3207_v31  ;;  %1340 = vmatprep.mubr.f32.mxu0 %v3208_v32 }
 0x412   :  { %1378 = vmatpush1.msra.mxu1 %v3209_v33  ;;  %1411 = vmatprep.mubr.f32.mxu1 %v3208_v32 }
 0x413   :  { %1443 = vmatprep.subr.mxu0 %v2645_v34  ;;  %1514 = vmatprep.subr.mxu1 %v2648_v35 }
 0x4b2   :  { %v1175_v15 = vpop.f32.mrf.mxu0  ;;  %v1246_v18 = vpop.f32.mrf.mxu1 }
 0x4b3   :  { %v1251_v17 = vadd.f32 %v1175_v15, %v3220_v16  ;;  %v1253_v24 = vadd.f32 %v1246_v18, %v3222_v23 }
 0x4b4   :  { %v1177_v20 = vpop.f32.mrf.mxu0  ;;  %v1248_v25 = vpop.f32.mrf.mxu1 }
 0x4b5   :  { %1864 = vtanh.f32 %v1251_v17  ;;  %v1252_v22 = vadd.f32 %v1177_v20, %v3221_v21  ;;  %v1254_v27 = vadd.f32 %v1248_v25, %v3223_v26  ;;  %v2877_v25 = vld [vmem:[#allocation4 + $0x60] sm:$0xff]  ;;  %v2880_v26 = vld [vmem:[#allocation4 + $0x70] sm:$0xff] }
 0x4b6   :  { %3228 = vst [vmem:[#allocation34_spill] sm:$0xff] %v2877_v25  ;;  %3229 = vst [vmem:[#allocation33_spill] sm:$0xff] %v2880_v26 }
 0x4b7   :  { %1866 = vtanh.f32 %v1252_v22 }
 0x4b8   :  { %1868 = vtanh.f32 %v1253_v24  ;;  %v2874_v24 = vld [vmem:[#allocation4 + $0x78] sm:$0xff] }
 0x4b9   :  { %1870 = vtanh.f32 %v1254_v27  ;;  %3227 = vst [vmem:[#allocation32_spill] sm:$0xff] %v2874_v24  ;;  %v2883_v27 = vld [vmem:[#allocation4 + $0x48] sm:$0xff] }
 0x4ba   :  { %3230 = vst [vmem:[#allocation35_spill] sm:$0xff] %v2883_v27 }
 0x4c2   :  { %v1865_v29 = vpop.eup %1864 }
 0x4c3   :  { %v1259_v30 = vmul.f32 0.5, %v1865_v29  ;;  %v2886_v29 = vld [vmem:[#allocation4 + $0x58] sm:$0xff] }
 0x4c4   :  { %v1867_v31 = vpop.eup %1866  ;;  %3231 = vst [vmem:[#allocation10_spill] sm:$0xff] %v2886_v29 }
 0x4c5   :  { %v1263_v33 = vadd.f32 0.5, %v1259_v30  ;;  %v1260_v35 = vmul.f32 0.5, %v1867_v31  ;;  %v1869_v15 = vpop.eup %1868  ;;  %v2889_v30 = vld [vmem:[#allocation4 + $0x40] sm:$0xff]  ;;  %v2892_v31 = vld [vmem:[#allocation4 + $0x50] sm:$0xff] }
 0x4c6   :  { %v1871_v18 = vpop.eup %1870  ;;  %3232 = vst [vmem:[#allocation11_spill] sm:$0xff] %v2889_v30  ;;  %3233 = vst [vmem:[#allocation12_spill] sm:$0xff] %v2892_v31 }
 0x4c7   :  { %v1264_v34 = vadd.f32 0.5, %v1260_v35  ;;  %v1268_v17 = vmul.f32 %v1869_v15, %v1263_v33  ;;  %v1262_v20 = vmul.f32 0.5, %v1871_v18  ;;  %v3225_v35 = vld [vmem:[#allocation29_spill] sm:$0xff]  ;;  %v2895_v33 = vld [vmem:[#allocation4 + $0x28] sm:$0xff]  ;;  %v2898_v15 = vld [vmem:[#allocation4 + $0x38] sm:$0xff] }
 0x4c8   :  { %3234 = vst [vmem:[#allocation13_spill] sm:$0xff] %v2895_v33  ;;  %3235 = vst [vmem:[#allocation14_spill] sm:$0xff] %v2898_v15  ;;  %v2907_v18 = vld [vmem:[#allocation4 + $0x8] sm:$0xff] }
 0x4c9   :  { %v1267_v16 = vmul.f32 %v1264_v34, %v2656_v61  ;;  %v1266_v21 = vadd.f32 0.5, %v1262_v20  ;;  %v3224_v34 = vld [vmem:[#allocation30_spill] sm:$0xff]  ;;  %v2871_v61 = vld [vmem:[#allocation4 + $0x68] sm:$0xff]  ;;  %3238 = vst [vmem:[#allocation17_spill] sm:$0xff] %v2907_v18 }
 0x4ca   :  { %3226 = vst [vmem:[#allocation8_spill] sm:$0xff] %v2871_v61  ;;  %v2910_v20 = vld [vmem:[#allocation4 + $0x18] sm:$0xff] }
 0x4cb   :  { %v2822_v32 = vadd.f32 %v1268_v17, %v1267_v16  ;;  %v2901_v16 = vld [vmem:[#allocation4 + $0x20] sm:$0xff]  ;;  %v2904_v17 = vld [vmem:[#allocation4 + $0x30] sm:$0xff]  ;;  %3239 = vst [vmem:[#allocation18_spill] sm:$0xff] %v2910_v20 }
 0x4cc   :  { %3236 = vst [vmem:[#allocation15_spill] sm:$0xff] %v2901_v16  ;;  %3237 = vst [vmem:[#allocation16_spill] sm:$0xff] %v2904_v17 }
 0x4cd   :  { %1872 = vtanh.f32 %v2822_v32 }
 0x4da   :  { %v1873_v22 = vpop.eup %1872 }
 0x4db   :  { %v1271_v23 = vmul.f32 %v1873_v22, %v1266_v21  ;;  %v2913_v21 = vld [vmem:[#allocation4] sm:$0xff]  ;;  %v3241_v22 = vmov 0.0  }
 0x4dc   :  { %3240 = vst [vmem:[#allocation19_spill] sm:$0xff] %v2913_v21 }
 0x4dd   :  { %1341 = vmatmul.mubr.f32.vlgmr.msra.gmra.mxu0 %v1271_v23  ;;  %1412 = vmatmul.mubr.f32.vlgmr.msra.gmra.mxu1 %v1271_v23  ;;  %v2917_v23 = vld [vmem:[#allocation4 + $0x10] sm:$0xff] }
 0x4de   :  { %1444 = vmatpush1.msra.mxu0 %v2659_v3  ;;  %1515 = vmatpush1.msra.mxu1 %v2662_v9  ;;  %3242 = vst [vmem:[#allocation20_spill] sm:$0xff] %v2917_v23 }
 0x4df   :  { %1445 = vmatprep.subr.mxu0 %v2665_v28  ;;  %1516 = vmatprep.subr.mxu1 %v2668_v10 }
 0x4e0   :  { %1446 = vmatpush1.msra.mxu0 %v2671_v11  ;;  %1517 = vmatpush1.msra.mxu1 %v2674_v6 }
 0x4e1   :  { %1447 = vmatprep.subr.mxu0 %v2677_v4  ;;  %1518 = vmatprep.subr.mxu1 %v2680_v7 }
 0x4e2   :  { %1448 = vmatpush1.msra.mxu0 %v2683_v55  ;;  %1519 = vmatpush1.msra.mxu1 %v2686_v0 }
 0x4e3   :  { %1449 = vmatprep.subr.mxu0 %v2689_v5  ;;  %1520 = vmatprep.subr.mxu1 %v2692_v46 }
 0x4e4   :  { %1450 = vmatpush1.msra.mxu0 %v2695_v12  ;;  %1521 = vmatpush1.msra.mxu1 %v2698_v19 }
 0x4e5   :  { %1451 = vmatprep.subr.mxu0 %v2701_v8  ;;  %1522 = vmatprep.subr.mxu1 %v2704_v37 }
 0x4e6   :  { %1452 = vmatpush1.msra.mxu0 %v2707_v13  ;;  %1523 = vmatpush1.msra.mxu1 %v2710_v14 }
 0x4e7   :  { %1453 = vmatprep.subr.mxu0 %v2713_v36  ;;  %1524 = vmatprep.subr.mxu1 %v2716_v38 }
 0x4e8   :  { %1454 = vmatpush1.msra.mxu0 %v2719_v39  ;;  %1525 = vmatpush1.msra.mxu1 %v2722_v40 }
 0x4e9   :  { %1455 = vmatprep.subr.mxu0 %v2725_v41  ;;  %1526 = vmatprep.subr.mxu1 %v2728_v42 }
 0x4ea   :  { %1456 = vmatpush1.msra.mxu0 %v2731_v43  ;;  %1527 = vmatpush1.msra.mxu1 %v2734_v44 }
 0x4eb   :  { %1457 = vmatprep.subr.mxu0 %v2737_v45  ;;  %1528 = vmatprep.subr.mxu1 %v2740_v47 }
 0x4ec   :  { %1458 = vmatpush1.msra.mxu0 %v2743_v48  ;;  %1529 = vmatpush1.msra.mxu1 %v2746_v49 }
 0x4ed   :  { %1459 = vmatprep.subr.mxu0 %v2749_v50  ;;  %1530 = vmatprep.subr.mxu1 %v2752_v51 }
 0x4ee   :  { %1460 = vmatpush1.msra.mxu0 %v2755_v52  ;;  %1531 = vmatpush1.msra.mxu1 %v2758_v53 }
 0x4ef   :  { %1461 = vmatprep.subr.mxu0 %v2761_v54  ;;  %1532 = vmatprep.subr.mxu1 %v2764_v56 }
 0x4f0   :  { %1462 = vmatpush1.msra.mxu0 %v2767_v57  ;;  %1533 = vmatpush1.msra.mxu1 %v2770_v58 }
 0x4f1   :  { %1463 = vmatprep.subr.mxu0 %v3224_v34  ;;  %1534 = vmatprep.subr.mxu1 %v3225_v35 }
 0x4f2   :  { %1464 = vmatpush1.msra.mxu0 %v2779_v60  ;;  %1535 = vmatpush1.msra.mxu1 %v2782_v62 }
 0x4f3   :  { %1465 = vmatprep.subr.mxu0 %v2785_v63  ;;  %1536 = vmatprep.subr.mxu1 %v2788_v2 }
 0x4f4   :  { %1466 = vmatpush1.msra.mxu0 %v2791_v59  ;;  %1537 = vmatpush1.msra.mxu1 %v2794_v1 }
 0x4f5   :  { %1467 = vmatprep.subr.mxu0 %v2871_v61  ;;  %1538 = vmatprep.subr.mxu1 %v2874_v24 }
 0x4f6   :  { %1468 = vmatpush1.msra.mxu0 %v2877_v25  ;;  %1539 = vmatpush1.msra.mxu1 %v2880_v26 }
 0x4f7   :  { %1469 = vmatprep.subr.mxu0 %v2883_v27  ;;  %1540 = vmatprep.subr.mxu1 %v2886_v29  ;;  %v3247_v29 = vld [vmem:[#allocation45_spill] sm:$0xff] }
 0x4f8   :  { %1470 = vmatpush1.msra.mxu0 %v2889_v30  ;;  %1541 = vmatpush1.msra.mxu1 %v2892_v31  ;;  %v3246_v30 = vld [vmem:[#allocation46_spill] sm:$0xff] }
 0x4f9   :  { %1471 = vmatprep.subr.mxu0 %v2895_v33  ;;  %1542 = vmatprep.subr.mxu1 %v2898_v15  ;;  %v3245_v15 = vld [vmem:[#allocation44_spill] sm:$0xff] }
 0x4fa   :  { %1472 = vmatpush1.msra.mxu0 %v2901_v16  ;;  %1543 = vmatpush1.msra.mxu1 %v2904_v17  ;;  %v3243_v17 = vld [vmem:[#allocation9_spill] sm:$0xff]  ;;  %v3244_v16 = vld [vmem:[#allocation28_spill] sm:$0xff] }
 0x4fb   :  { %1473 = vmatprep.subr.mxu0 %v2907_v18  ;;  %1544 = vmatprep.subr.mxu1 %v2910_v20 }
 0x4fc   :  { %1474 = vmatpush1.msra.mxu0 %v2913_v21  ;;  %1507 = vmatprep.mubr.f32.mxu0 %v3241_v22 }
 0x4fd   :  { %1545 = vmatpush1.msra.mxu1 %v2917_v23  ;;  %1578 = vmatprep.mubr.f32.mxu1 %v3241_v22  ;;  %v3248_v23 = vld [vmem:[#allocation47_spill] sm:$0xff] }
 0x4fe   :  { %1610 = vmatprep.subr.mxu0 %v3243_v17  ;;  %1681 = vmatprep.subr.mxu1 %v3244_v16 }
 0x59d   :  { %v1342_v18 = vpop.f32.mrf.mxu0  ;;  %v1413_v20 = vpop.f32.mrf.mxu1 }
 0x59e   :  { %v1418_v33 = vadd.f32 %v1342_v18, %v3245_v15  ;;  %v1420_v27 = vadd.f32 %v1413_v20, %v3247_v29 }
 0x59f   :  { %v1344_v31 = vpop.f32.mrf.mxu0  ;;  %v1415_v26 = vpop.f32.mrf.mxu1 }
 0x5a0   :  { %1874 = vtanh.f32 %v1418_v33  ;;  %v1419_v21 = vadd.f32 %v1344_v31, %v3246_v30  ;;  %v1421_v25 = vadd.f32 %v1415_v26, %v3248_v23 }
 0x5a2   :  { %1876 = vtanh.f32 %v1419_v21 }
 0x5a3   :  { %1878 = vtanh.f32 %v1420_v27 }
 0x5a4   :  { %1880 = vtanh.f32 %v1421_v25 }
 0x5ad   :  { %v1875_v22 = vpop.eup %1874 }
 0x5ae   :  { %v1426_v24 = vmul.f32 0.5, %v1875_v22  ;;  %v3273_v22 = vld [vmem:[#allocation54_spill] sm:$0xff] }
 0x5af   :  { %v1877_v17 = vpop.eup %1876 }
 0x5b0   :  { %v1430_v61 = vadd.f32 0.5, %v1426_v24  ;;  %v1427_v16 = vmul.f32 0.5, %v1877_v17  ;;  %v1879_v15 = vpop.eup %1878  ;;  %v3272_v24 = vld [vmem:[#allocation52_spill] sm:$0xff]  ;;  %v3274_v17 = vld [vmem:[#allocation53_spill] sm:$0xff] }
 0x5b1   :  { %v1881_v29 = vpop.eup %1880 }
 0x5b2   :  { %v1431_v1 = vadd.f32 0.5, %v1427_v16  ;;  %v1435_v33 = vmul.f32 %v1879_v15, %v1430_v61  ;;  %v1429_v27 = vmul.f32 0.5, %v1881_v29  ;;  %v3275_v15 = vld [vmem:[#allocation55_spill] sm:$0xff] }
 0x5b4   :  { %v1434_v18 = vmul.f32 %v1431_v1, %v2822_v32  ;;  %v1433_v30 = vadd.f32 0.5, %v1429_v27  ;;  %v3249_v32 = vld [vmem:[#allocation31_spill] sm:$0xff] }
 0x5b6   :  { %v2928_v59 = vadd.f32 %v1435_v33, %v1434_v18 }
 0x5b8   :  { %1882 = vtanh.f32 %v2928_v59 }
 0x5c5   :  { %v1883_v31 = vpop.eup %1882 }
 0x5c6   :  { %v1438_v26 = vmul.f32 %v1883_v31, %v1433_v30 }
 0x5c8   :  { %1508 = vmatmul.mubr.f32.vlgmr.msra.gmra.mxu0 %v1438_v26  ;;  %1579 = vmatmul.mubr.f32.vlgmr.msra.gmra.mxu1 %v1438_v26 }
 0x5c9   :  { %1611 = vmatpush1.msra.mxu0 %v2659_v3  ;;  %1682 = vmatpush1.msra.mxu1 %v2662_v9  ;;  %v3250_v3 = vld [vmem:[#allocation7_spill] sm:$0xff]  ;;  %v3251_v9 = vld [vmem:[#allocation8_spill] sm:$0xff] }
 0x5ca   :  { %1612 = vmatprep.subr.mxu0 %v2665_v28  ;;  %1683 = vmatprep.subr.mxu1 %v2668_v10  ;;  %v3252_v28 = vld [vmem:[#allocation32_spill] sm:$0xff]  ;;  %v3253_v10 = vld [vmem:[#allocation34_spill] sm:$0xff] }
 0x5cb   :  { %1613 = vmatpush1.msra.mxu0 %v2671_v11  ;;  %1684 = vmatpush1.msra.mxu1 %v2674_v6  ;;  %v3254_v11 = vld [vmem:[#allocation33_spill] sm:$0xff]  ;;  %v3255_v6 = vld [vmem:[#allocation35_spill] sm:$0xff] }
 0x5cc   :  { %1614 = vmatprep.subr.mxu0 %v2677_v4  ;;  %1685 = vmatprep.subr.mxu1 %v2680_v7  ;;  %v3256_v4 = vld [vmem:[#allocation10_spill] sm:$0xff]  ;;  %v3257_v7 = vld [vmem:[#allocation11_spill] sm:$0xff] }
 0x5cd   :  { %1615 = vmatpush1.msra.mxu0 %v2683_v55  ;;  %1686 = vmatpush1.msra.mxu1 %v2686_v0  ;;  %v3258_v55 = vld [vmem:[#allocation12_spill] sm:$0xff]  ;;  %v3259_v0 = vld [vmem:[#allocation13_spill] sm:$0xff] }
 0x5ce   :  { %1616 = vmatprep.subr.mxu0 %v2689_v5  ;;  %1687 = vmatprep.subr.mxu1 %v2692_v46  ;;  %v3260_v5 = vld [vmem:[#allocation14_spill] sm:$0xff]  ;;  %v3261_v46 = vld [vmem:[#allocation15_spill] sm:$0xff] }
 0x5cf   :  { %1617 = vmatpush1.msra.mxu0 %v2695_v12  ;;  %1688 = vmatpush1.msra.mxu1 %v2698_v19  ;;  %v3262_v12 = vld [vmem:[#allocation16_spill] sm:$0xff]  ;;  %v3263_v19 = vld [vmem:[#allocation17_spill] sm:$0xff] }
 0x5d0   :  { %1618 = vmatprep.subr.mxu0 %v2701_v8  ;;  %1689 = vmatprep.subr.mxu1 %v2704_v37  ;;  %v3264_v8 = vld [vmem:[#allocation18_spill] sm:$0xff]  ;;  %v3265_v37 = vld [vmem:[#allocation19_spill] sm:$0xff] }
 0x5d1   :  { %1619 = vmatpush1.msra.mxu0 %v2707_v13  ;;  %1690 = vmatpush1.msra.mxu1 %v2710_v14  ;;  %v3266_v13 = vmov 0.0   ;;  %v3267_v14 = vld [vmem:[#allocation20_spill] sm:$0xff] }
 0x5d2   :  { %1620 = vmatprep.subr.mxu0 %v2713_v36  ;;  %1691 = vmatprep.subr.mxu1 %v2716_v38  ;;  %v3268_v38 = vld [vmem:[#allocation48_spill] sm:$0xff] }
 0x5d3   :  { %1621 = vmatpush1.msra.mxu0 %v2719_v39  ;;  %1692 = vmatpush1.msra.mxu1 %v2722_v40 }
 0x5d4   :  { %1622 = vmatprep.subr.mxu0 %v2725_v41  ;;  %1693 = vmatprep.subr.mxu1 %v2728_v42  ;;  %v3269_v42 = vld [vmem:[#allocation50_spill] sm:$0xff] }
 0x5d5   :  { %1623 = vmatpush1.msra.mxu0 %v2731_v43  ;;  %1694 = vmatpush1.msra.mxu1 %v2734_v44  ;;  %v3270_v44 = vld [vmem:[#allocation49_spill] sm:$0xff] }
 0x5d6   :  { %1624 = vmatprep.subr.mxu0 %v2737_v45  ;;  %1695 = vmatprep.subr.mxu1 %v2740_v47 }
 0x5d7   :  { %1625 = vmatpush1.msra.mxu0 %v2743_v48  ;;  %1696 = vmatpush1.msra.mxu1 %v2746_v49  ;;  %v3271_v48 = vld [vmem:[#allocation51_spill] sm:$0xff] }
 0x5d8   :  { %1626 = vmatprep.subr.mxu0 %v2749_v50  ;;  %1697 = vmatprep.subr.mxu1 %v2752_v51 }
 0x5d9   :  { %1627 = vmatpush1.msra.mxu0 %v2755_v52  ;;  %1698 = vmatpush1.msra.mxu1 %v2758_v53 }
 0x5da   :  { %1628 = vmatprep.subr.mxu0 %v2761_v54  ;;  %1699 = vmatprep.subr.mxu1 %v2764_v56 }
 0x5db   :  { %1629 = vmatpush1.msra.mxu0 %v2767_v57  ;;  %1700 = vmatpush1.msra.mxu1 %v2770_v58 }
 0x5dc   :  { %1630 = vmatprep.subr.mxu0 %v3224_v34  ;;  %1701 = vmatprep.subr.mxu1 %v3225_v35 }
 0x5dd   :  { %1631 = vmatpush1.msra.mxu0 %v2779_v60  ;;  %1702 = vmatpush1.msra.mxu1 %v2782_v62 }
 0x5de   :  { %1632 = vmatprep.subr.mxu0 %v2785_v63  ;;  %1703 = vmatprep.subr.mxu1 %v2788_v2 }
 0x5df   :  { %1633 = vmatpush1.msra.mxu0 %v3249_v32  ;;  %1704 = vmatpush1.msra.mxu1 %v3250_v3 }
 0x5e0   :  { %1634 = vmatprep.subr.mxu0 %v3251_v9  ;;  %1705 = vmatprep.subr.mxu1 %v3252_v28 }
 0x5e1   :  { %1635 = vmatpush1.msra.mxu0 %v3253_v10  ;;  %1706 = vmatpush1.msra.mxu1 %v3254_v11 }
 0x5e2   :  { %1636 = vmatprep.subr.mxu0 %v3255_v6  ;;  %1707 = vmatprep.subr.mxu1 %v3256_v4 }
 0x5e3   :  { %1637 = vmatpush1.msra.mxu0 %v3257_v7  ;;  %1708 = vmatpush1.msra.mxu1 %v3258_v55  ;;  %v1818_v7 = vld [vmem:[%s3013_s3] ss:$0 sm:$0xff] }
 0x5e4   :  { %1638 = vmatprep.subr.mxu0 %v3259_v0  ;;  %1709 = vmatprep.subr.mxu1 %v3260_v5  ;;  %v1819_v5 = vld [vmem:[#allocation3] ss:$0 sm:$0xff] }
 0x5e5   :  { %1639 = vmatpush1.msra.mxu0 %v3261_v46  ;;  %1710 = vmatpush1.msra.mxu1 %v3262_v12 }
 0x5e6   :  { %1640 = vmatprep.subr.mxu0 %v3263_v19  ;;  %1711 = vmatprep.subr.mxu1 %v3264_v8 }
 0x5e7   :  { %1641 = vmatpush1.msra.mxu0 %v3265_v37  ;;  %1674 = vmatprep.mubr.f32.mxu0 %v3266_v13 }
 0x5e8   :  { %1712 = vmatpush1.msra.mxu1 %v3267_v14  ;;  %1745 = vmatprep.mubr.f32.mxu1 %v3266_v13 }
 0x688   :  { %v1509_v36 = vpop.f32.mrf.mxu0  ;;  %v1580_v40 = vpop.f32.mrf.mxu1 }
 0x689   :  { %v1585_v39 = vadd.f32 %v1509_v36, %v3268_v38  ;;  %v1587_v45 = vadd.f32 %v1580_v40, %v3270_v44 }
 0x68a   :  { %v1511_v41 = vpop.f32.mrf.mxu0  ;;  %v1582_v47 = vpop.f32.mrf.mxu1 }
 0x68b   :  { %1884 = vtanh.f32 %v1585_v39  ;;  %v1586_v43 = vadd.f32 %v1511_v41, %v3269_v42  ;;  %v1588_v49 = vadd.f32 %v1582_v47, %v3271_v48 }
 0x68d   :  { %1886 = vtanh.f32 %v1586_v43 }
 0x68e   :  { %1888 = vtanh.f32 %v1587_v45 }
 0x68f   :  { %1890 = vtanh.f32 %v1588_v49 }
 0x698   :  { %v1885_v50 = vpop.eup %1884 }
 0x699   :  { %v1593_v51 = vmul.f32 0.5, %v1885_v50 }
 0x69a   :  { %v1887_v52 = vpop.eup %1886 }
 0x69b   :  { %v1597_v53 = vadd.f32 0.5, %v1593_v51  ;;  %v1594_v54 = vmul.f32 0.5, %v1887_v52  ;;  %v1889_v57 = vpop.eup %1888 }
 0x69c   :  { %v1891_v62 = vpop.eup %1890 }
 0x69d   :  { %v1598_v56 = vadd.f32 0.5, %v1594_v54  ;;  %v1602_v1 = vmul.f32 %v1889_v57, %v1597_v53  ;;  %v1596_v63 = vmul.f32 0.5, %v1891_v62 }
 0x69f   :  { %v1601_v58 = vmul.f32 %v1598_v56, %v2928_v59  ;;  %v1600_v2 = vadd.f32 0.5, %v1596_v63 }
 0x6a1   :  { %v1603_v60 = vadd.f32 %v1602_v1, %v1601_v58 }
 0x6a3   :  { %1892 = vtanh.f32 %v1603_v60 }
 0x6b0   :  { %v1893_v34 = vpop.eup %1892 }
 0x6b1   :  { %v1605_v35 = vmul.f32 %v1893_v34, %v1600_v2 }
 0x6b3   :  { %1675 = vmatmul.mubr.f32.vlgmr.msra.gmra.mxu0 %v1605_v35  ;;  %1746 = vmatmul.mubr.f32.vlgmr.msra.gmra.mxu1 %v1605_v35 }
 0x773   :  { %v1676_v61 = vpop.f32.mrf.mxu0  ;;  %v1747_v20 = vpop.f32.mrf.mxu1 }
 0x774   :  { %v1752_v25 = vadd.f32 %v1676_v61, %v3272_v24  ;;  %v1754_v59 = vadd.f32 %v1747_v20, %v3274_v17 }
 0x775   :  { %v1678_v21 = vpop.f32.mrf.mxu0  ;;  %v1749_v16 = vpop.f32.mrf.mxu1 }
 0x776   :  { %1894 = vtanh.f32 %v1752_v25  ;;  %v1753_v23 = vadd.f32 %v1678_v21, %v3273_v22  ;;  %v1755_v18 = vadd.f32 %v1749_v16, %v3275_v15 }
 0x778   :  { %1896 = vtanh.f32 %v1753_v23 }
 0x779   :  { %1898 = vtanh.f32 %v1754_v59 }
 0x77a   :  { %1900 = vtanh.f32 %v1755_v18 }
 0x783   :  { %v1895_v33 = vpop.eup %1894 }
 0x784   :  { %v1760_v29 = vmul.f32 0.5, %v1895_v33 }
 0x785   :  { %v1897_v27 = vpop.eup %1896 }
 0x786   :  { %v1764_v30 = vadd.f32 0.5, %v1760_v29  ;;  %v1761_v31 = vmul.f32 0.5, %v1897_v27  ;;  %v1899_v32 = vpop.eup %1898 }
 0x787   :  { %v1901_v10 = vpop.eup %1900 }
 0x788   :  { %v1765_v26 = vadd.f32 0.5, %v1761_v31  ;;  %v1769_v9 = vmul.f32 %v1899_v32, %v1764_v30  ;;  %v1763_v11 = vmul.f32 0.5, %v1901_v10 }
 0x78a   :  { %v1768_v3 = vmul.f32 %v1765_v26, %v1603_v60  ;;  %v1767_v6 = vadd.f32 0.5, %v1763_v11 }
 0x78c   :  { %v1770_v28 = vadd.f32 %v1769_v9, %v1768_v3 }
 0x78e   :  { %1902 = vtanh.f32 %v1770_v28 }
 0x79b   :  { %v1903_v4 = vpop.eup %1902 }
 0x79c   :  { %v1772_v55 = vmul.f32 %v1903_v4, %v1767_v6 }
 0x79e   :  { %v1780_v0 = vmul.f32 %v1818_v7, %v1772_v55 }
 0x7a0   :  { %1781 = vadd.xlane.f32.xlu0 %v1780_v0 }
 0x829   :  { %v1782_v46 = vpop.xlane.xlu0 %1781 }
 0x82a   :  { %v1790_v12 = vadd.f32 %v1819_v5, %v1782_v46 }
 0x82c   :  { %1792 = vst.msk [vmem:[%s3015_s5] sm:$0xff] %vm1791_vm2, %v1790_v12 }
 0x82d   :  { %1797 = vsyncpa [#allocation5], 1 }

</bundles_post_ra>
